<compile_context>
chip_gen: v7x
topology: tpu7x:2x2x1
jax: 0.10.0
libtpu: 0.0.40
codegen_flags: <defaults>
</compile_context>

<pallas_src>
import functools
import math

import jax
import jax.numpy as jnp
from jax import lax
from jax.experimental import pallas as pl
from jax.experimental.pallas import tpu as pltpu

_LN_EPS = 1e-5


def _row_layernorm(v, g, b):
    """Standard LayerNorm over the last (embedding) axis. v: (R, D) f32."""
    mu = jnp.mean(v, axis=-1, keepdims=True)
    c = v - mu
    var = jnp.mean(c * c, axis=-1, keepdims=True)
    return c * lax.rsqrt(var + _LN_EPS) * g + b


def _head_layernorm(t, avg, g_tiled, b_tiled):
    """Per-head LayerNorm of t (R, D = H*hd) in full lane-width layout.

    `avg` is a (D, D) block-diagonal matrix with 1/hd inside each head block, so
    t @ avg gives every column its head's mean (already broadcast across the head).
    Keeps statistics lane-dense and uses the MXU instead of narrow XLU reductions."""
    mu = jnp.dot(t, avg, preferred_element_type=jnp.float32)
    c = t - mu
    var = jnp.dot(c * c, avg, preferred_element_type=jnp.float32)
    return c * lax.rsqrt(var + _LN_EPS) * g_tiled + b_tiled


def _mmt_kernel(num_heads, compute_dtype,
                x_ref, mm0_ref, mm1_ref,
                avg_ref,
                w_qkv_ref, w_kv0_ref, w_kv1_ref,
                qg_ref, qb_ref, kg_ref, kb_ref,
                wu_ref, bu_ref,
                g1_ref, b1_ref,
                w1_ref, bm1_ref, w2_ref, bm2_ref,
                g2_ref, b2_ref,
                o_ref,
                k_scr, v_scr):
    cd = compute_dtype
    x = x_ref[0]                      # (S, D) f32
    m0 = mm0_ref[0]                   # (Sm0, D) f32
    m1 = mm1_ref[0]                   # (Sm1, D) f32
    S, D = x.shape
    Sm0 = m0.shape[0]
    Sm1 = m1.shape[0]
    hd = D // num_heads
    avg = avg_ref[...]

    # --- fused attention projections (kqv_bias=False): 3 wide bf16 matmuls, f32 acc ---
    qkv = jnp.dot(x.astype(cd), w_qkv_ref[...],
                  preferred_element_type=jnp.float32)          # (S, 3D)
    kv0 = jnp.dot(m0.astype(cd), w_kv0_ref[...],
                  preferred_element_type=jnp.float32)          # (Sm0, 2D)
    kv1 = jnp.dot(m1.astype(cd), w_kv1_ref[...],
                  preferred_element_type=jnp.float32)          # (Sm1, 2D)

    qg, qb = qg_ref[...], qb_ref[...]                          # (1, D) tiled host-side
    kg, kb = kg_ref[...], kb_ref[...]
    scale = 1.0 / math.sqrt(D)

    # kqnorm (shared params across heads/streams); softmax scale folded into q.
    q_n = _head_layernorm(qkv[:, :D], avg, qg, qb) * scale     # (S, D) f32

    # Normalized keys / values written straight into VMEM scratch (no jnp.concatenate).
    k_scr[0:S, :] = _head_layernorm(qkv[:, D:2 * D], avg, kg, kb).astype(cd)
    k_scr[S:S + Sm0, :] = _head_layernorm(kv0[:, :D], avg, kg, kb).astype(cd)
    k_scr[S + Sm0:S + Sm0 + Sm1, :] = _head_layernorm(kv1[:, :D], avg, kg, kb).astype(cd)
    v_scr[0:S, :] = qkv[:, 2 * D:].astype(cd)
    v_scr[S:S + Sm0, :] = kv0[:, D:].astype(cd)
    v_scr[S + Sm0:S + Sm0 + Sm1, :] = kv1[:, D:].astype(cd)

    # --- per-head attention; head outputs folded directly into the unifying Linear ---
    attended = jnp.zeros((S, D), jnp.float32)
    for h in range(num_heads):                  # static, unrolled
        lo, hi = h * hd, (h + 1) * hd
        qh = q_n[:, lo:hi].astype(cd)           # (S, hd)
        kh = k_scr[:, lo:hi]                    # (S_tot, hd)
        vh = v_scr[:, lo:hi]                    # (S_tot, hd)
        s = jnp.einsum('sd,td->st', qh, kh,
                       preferred_element_type=jnp.float32)     # (S, S_tot) f32
        s = s - jnp.max(s, axis=-1, keepdims=True)
        e = jnp.exp(s)
        p = e * pl.reciprocal(jnp.sum(e, axis=-1, keepdims=True), approx=True)
        oh = jnp.dot(p.astype(cd), vh, preferred_element_type=jnp.float32)   # (S, hd)
        attended = attended + jnp.dot(oh.astype(cd), wu_ref[lo:hi, :],
                                      preferred_element_type=jnp.float32)
    attended = attended + bu_ref[...]

    # --- _forward_post_attention ---
    x1 = _row_layernorm(x + attended, g1_ref[...], b1_ref[...])
    h1 = jnp.maximum(
        jnp.dot(x1.astype(cd), w1_ref[...],
                preferred_element_type=jnp.float32) + bm1_ref[...], 0.0)
    t = jnp.dot(h1.astype(cd), w2_ref[...],
                preferred_element_type=jnp.float32) + bm2_ref[...]
    o_ref[0] = _row_layernorm(x1 + t, g2_ref[...], b2_ref[...]).astype(o_ref.dtype)


def _const_index_map(ndim):
    """Index map that always returns block (0,...,0) — grid-invariant weight, fetched once."""
    zeros = (0,) * ndim

    def index_map(b):
        return zeros

    return index_map


def multimodal_transformer(x, multimode, params, num_heads,
                           compute_dtype=jnp.bfloat16):
    B, S, D = x.shape
    mm0, mm1 = multimode
    (wq, wk, wv, wk0, wv0, wk1, wv1,
     qg, qb, kg, kb,
     wu, bu, g1, b1, w1, bm1, w2, bm2, g2, b2) = params
    hd = D // num_heads
    cd = compute_dtype

    # Host-side weight fusion (wide-N matmuls) and bf16 cast of all matmul weights.
    w_qkv = jnp.concatenate([wq, wk, wv], axis=1).astype(cd)   # (D, 3D)
    w_kv0 = jnp.concatenate([wk0, wv0], axis=1).astype(cd)     # (D, 2D)
    w_kv1 = jnp.concatenate([wk1, wv1], axis=1).astype(cd)     # (D, 2D)

    # Block-diagonal per-head averaging matrix for the kq LayerNorm statistics.
    head_ids = jnp.arange(D) // hd
    avg = jnp.where(head_ids[:, None] == head_ids[None, :],
                    1.0 / hd, 0.0).astype(jnp.float32)         # (D, D)

    # Tile the shared per-head LN params to full width (hoists broadcasts out of the kernel).
    qg_t = jnp.tile(qg, (1, num_heads)).astype(jnp.float32)
    qb_t = jnp.tile(qb, (1, num_heads)).astype(jnp.float32)
    kg_t = jnp.tile(kg, (1, num_heads)).astype(jnp.float32)
    kb_t = jnp.tile(kb, (1, num_heads)).astype(jnp.float32)

    weights = [avg, w_qkv, w_kv0, w_kv1,
               qg_t, qb_t, kg_t, kb_t,
               wu.astype(cd), bu.astype(jnp.float32),
               g1.astype(jnp.float32), b1.astype(jnp.float32),
               w1.astype(cd), bm1.astype(jnp.float32),
               w2.astype(cd), bm2.astype(jnp.float32),
               g2.astype(jnp.float32), b2.astype(jnp.float32)]

    S_tot = S + mm0.shape[1] + mm1.shape[1]

    in_specs = [
        pl.BlockSpec((1, S, D), lambda b: (b, 0, 0)),
        pl.BlockSpec((1,) + mm0.shape[1:], lambda b: (b, 0, 0)),
        pl.BlockSpec((1,) + mm1.shape[1:], lambda b: (b, 0, 0)),
    ] + [pl.BlockSpec(p.shape, _const_index_map(p.ndim)) for p in weights]

    out_spec = pl.BlockSpec((1, S, D), lambda b: (b, 0, 0))

    return pl.pallas_call(
        functools.partial(_mmt_kernel, num_heads, cd),
        out_shape=jax.ShapeDtypeStruct((B, S, D), x.dtype),
        grid_spec=pltpu.PrefetchScalarGridSpec(
            num_scalar_prefetch=0,
            grid=(B,),
            in_specs=in_specs,
            out_specs=out_spec,
            scratch_shapes=[pltpu.VMEM((S_tot, D), cd),    # normalized K (self + multimodal)
                            pltpu.VMEM((S_tot, D), cd)],   # V (self + multimodal)
        ),
        compiler_params=pltpu.CompilerParams(
            dimension_semantics=("parallel",),
            vmem_limit_bytes=32 * 1024 * 1024,   # safe on v5e / v6e / v7x; working set is tiny
        ),
    )(x, mm0, mm1, *weights)


def init_params(key, D, H, expansion=1):
    hd = D // H
    ks = jax.random.split(key, 14)

    def lin_w(k, fan_in, fan_out):
        lim = 1.0 / math.sqrt(fan_in)
        return jax.random.uniform(k, (fan_in, fan_out), jnp.float32, -lim, lim)

    def lin_b(k, fan_in, fan_out):
        lim = 1.0 / math.sqrt(fan_in)
        return jax.random.uniform(k, (1, fan_out), jnp.float32, -lim, lim)

    wq = lin_w(ks[0], D, D)
    wk = lin_w(ks[1], D, D)
    wv = lin_w(ks[2], D, D)
    wk0 = lin_w(ks[3], D, D)
    wv0 = lin_w(ks[4], D, D)
    wk1 = lin_w(ks[5], D, D)
    wv1 = lin_w(ks[6], D, D)
    qg, qb = jnp.ones((1, hd), jnp.float32), jnp.zeros((1, hd), jnp.float32)
    kg, kb = jnp.ones((1, hd), jnp.float32), jnp.zeros((1, hd), jnp.float32)
    wu = lin_w(ks[7], D, D)
    bu = lin_b(ks[8], D, D)
    g1, b1 = jnp.ones((1, D), jnp.float32), jnp.zeros((1, D), jnp.float32)
    w1 = lin_w(ks[9], D, D * expansion)
    bm1 = lin_b(ks[10], D, D * expansion)
    w2 = lin_w(ks[11], D * expansion, D)
    bm2 = lin_b(ks[12], D * expansion, D)
    g2, b2 = jnp.ones((1, D), jnp.float32), jnp.zeros((1, D), jnp.float32)
    return (wq, wk, wv, wk0, wv0, wk1, wv1,
            qg, qb, kg, kb,
            wu, bu,
            g1, b1,
            w1, bm1, w2, bm2,
            g2, b2)


if __name__ == "__main__":
    key = jax.random.PRNGKey(0)
    kx, km0, km1, kp = jax.random.split(key, 4)

    B, S, Sm, D, H = 2, 16, 16, 64, 4   # batch, seq, multimodal seq, embedding, heads
    x = jax.random.normal(kx, (B, S, D), jnp.float32)
    mm0 = jax.random.normal(km0, (B, Sm, D), jnp.float32)
    mm1 = jax.random.normal(km1, (B, Sm, D), jnp.float32)
    params = init_params(kp, D, H, expansion=1)

    out = multimodal_transformer(x, (mm0, mm1), params, H)
    jax.block_until_ready(out)
    assert out.shape == (B, S, D) and out.dtype == jnp.float32
    assert bool(jnp.all(jnp.isfinite(out)))
    print("KERNEL_OK")
</pallas_src>

<mosaic_0001>
module attributes {stable_mosaic.version = 11 : i64} {
  func.func @_mmt_kernel(%arg0: i32, %arg1: memref<1x16x64xf32, #tpu.memory_space<vmem>>, %arg2: memref<1x16x64xf32, #tpu.memory_space<vmem>>, %arg3: memref<1x16x64xf32, #tpu.memory_space<vmem>>, %arg4: memref<64x64xf32, #tpu.memory_space<vmem>>, %arg5: memref<64x192xbf16, #tpu.memory_space<vmem>>, %arg6: memref<64x128xbf16, #tpu.memory_space<vmem>>, %arg7: memref<64x128xbf16, #tpu.memory_space<vmem>>, %arg8: memref<1x64xf32, #tpu.memory_space<vmem>>, %arg9: memref<1x64xf32, #tpu.memory_space<vmem>>, %arg10: memref<1x64xf32, #tpu.memory_space<vmem>>, %arg11: memref<1x64xf32, #tpu.memory_space<vmem>>, %arg12: memref<64x64xbf16, #tpu.memory_space<vmem>>, %arg13: memref<1x64xf32, #tpu.memory_space<vmem>>, %arg14: memref<1x64xf32, #tpu.memory_space<vmem>>, %arg15: memref<1x64xf32, #tpu.memory_space<vmem>>, %arg16: memref<64x64xbf16, #tpu.memory_space<vmem>>, %arg17: memref<1x64xf32, #tpu.memory_space<vmem>>, %arg18: memref<64x64xbf16, #tpu.memory_space<vmem>>, %arg19: memref<1x64xf32, #tpu.memory_space<vmem>>, %arg20: memref<1x64xf32, #tpu.memory_space<vmem>>, %arg21: memref<1x64xf32, #tpu.memory_space<vmem>>, %arg22: memref<1x16x64xf32, #tpu.memory_space<vmem>>, %arg23: memref<48x64xbf16, #tpu.memory_space<vmem>>, %arg24: memref<48x64xbf16, #tpu.memory_space<vmem>>) attributes {dimension_semantics = [#tpu.dimension_semantics<parallel>], iteration_bounds = array<i64: 2>, scalar_prefetch = 0 : i64, scratch_operands = 2 : i64, tpu.core_type = #tpu.core_type<tc>, window_params = [{transform_indices = @transform_0, window_bounds = array<i64: 1, 16, 64>}, {transform_indices = @transform_1, window_bounds = array<i64: 1, 16, 64>}, {transform_indices = @transform_2, window_bounds = array<i64: 1, 16, 64>}, {pipeline_mode = #tpu.pipeline_mode<synchronous>, transform_indices = @transform_3, window_bounds = array<i64: 64, 64>}, {pipeline_mode = #tpu.pipeline_mode<synchronous>, transform_indices = @transform_4, window_bounds = array<i64: 64, 192>}, {pipeline_mode = #tpu.pipeline_mode<synchronous>, transform_indices = @transform_5, window_bounds = array<i64: 64, 128>}, {pipeline_mode = #tpu.pipeline_mode<synchronous>, transform_indices = @transform_6, window_bounds = array<i64: 64, 128>}, {pipeline_mode = #tpu.pipeline_mode<synchronous>, transform_indices = @transform_7, window_bounds = array<i64: 1, 64>}, {pipeline_mode = #tpu.pipeline_mode<synchronous>, transform_indices = @transform_8, window_bounds = array<i64: 1, 64>}, {pipeline_mode = #tpu.pipeline_mode<synchronous>, transform_indices = @transform_9, window_bounds = array<i64: 1, 64>}, {pipeline_mode = #tpu.pipeline_mode<synchronous>, transform_indices = @transform_10, window_bounds = array<i64: 1, 64>}, {pipeline_mode = #tpu.pipeline_mode<synchronous>, transform_indices = @transform_11, window_bounds = array<i64: 64, 64>}, {pipeline_mode = #tpu.pipeline_mode<synchronous>, transform_indices = @transform_12, window_bounds = array<i64: 1, 64>}, {pipeline_mode = #tpu.pipeline_mode<synchronous>, transform_indices = @transform_13, window_bounds = array<i64: 1, 64>}, {pipeline_mode = #tpu.pipeline_mode<synchronous>, transform_indices = @transform_14, window_bounds = array<i64: 1, 64>}, {pipeline_mode = #tpu.pipeline_mode<synchronous>, transform_indices = @transform_15, window_bounds = array<i64: 64, 64>}, {pipeline_mode = #tpu.pipeline_mode<synchronous>, transform_indices = @transform_16, window_bounds = array<i64: 1, 64>}, {pipeline_mode = #tpu.pipeline_mode<synchronous>, transform_indices = @transform_17, window_bounds = array<i64: 64, 64>}, {pipeline_mode = #tpu.pipeline_mode<synchronous>, transform_indices = @transform_18, window_bounds = array<i64: 1, 64>}, {pipeline_mode = #tpu.pipeline_mode<synchronous>, transform_indices = @transform_19, window_bounds = array<i64: 1, 64>}, {pipeline_mode = #tpu.pipeline_mode<synchronous>, transform_indices = @transform_20, window_bounds = array<i64: 1, 64>}, {transform_indices = @transform_21, window_bounds = array<i64: 1, 16, 64>}]} {
    %c0 = arith.constant 0 : index
    %c0_0 = arith.constant 0 : index
    %c0_1 = arith.constant 0 : index
    %0 = vector.load %arg1[%c0, %c0_0, %c0_1] : memref<1x16x64xf32, #tpu.memory_space<vmem>>, vector<1x16x64xf32>
    %1 = vector.shape_cast %0 : vector<1x16x64xf32> to vector<16x64xf32>
    %c0_2 = arith.constant 0 : index
    %c0_3 = arith.constant 0 : index
    %c0_4 = arith.constant 0 : index
    %2 = vector.load %arg2[%c0_2, %c0_3, %c0_4] : memref<1x16x64xf32, #tpu.memory_space<vmem>>, vector<1x16x64xf32>
    %3 = vector.shape_cast %2 : vector<1x16x64xf32> to vector<16x64xf32>
    %c0_5 = arith.constant 0 : index
    %c0_6 = arith.constant 0 : index
    %c0_7 = arith.constant 0 : index
    %4 = vector.load %arg3[%c0_5, %c0_6, %c0_7] : memref<1x16x64xf32, #tpu.memory_space<vmem>>, vector<1x16x64xf32>
    %5 = vector.shape_cast %4 : vector<1x16x64xf32> to vector<16x64xf32>
    %c0_8 = arith.constant 0 : index
    %c0_9 = arith.constant 0 : index
    %6 = vector.load %arg4[%c0_8, %c0_9] : memref<64x64xf32, #tpu.memory_space<vmem>>, vector<64x64xf32>
    %7 = arith.truncf %1 : vector<16x64xf32> to vector<16x64xbf16>
    %c0_10 = arith.constant 0 : index
    %c0_11 = arith.constant 0 : index
    %8 = vector.load %arg5[%c0_10, %c0_11] : memref<64x192xbf16, #tpu.memory_space<vmem>>, vector<64x192xbf16>
    %cst = arith.constant dense<0.000000e+00> : vector<16x192xf32>
    %9 = tpu.matmul %7, %8, %cst {dimension_numbers = #tpu.dot_dimension_numbers<[1], [0], [0], [1], [0, 0, 1, 1], [], []>} : vector<16x64xbf16>, vector<64x192xbf16>, vector<16x192xf32> -> vector<16x192xf32>
    %10 = arith.truncf %3 : vector<16x64xf32> to vector<16x64xbf16>
    %c0_12 = arith.constant 0 : index
    %c0_13 = arith.constant 0 : index
    %11 = vector.load %arg6[%c0_12, %c0_13] : memref<64x128xbf16, #tpu.memory_space<vmem>>, vector<64x128xbf16>
    %cst_14 = arith.constant dense<0.000000e+00> : vector<16x128xf32>
    %12 = tpu.matmul %10, %11, %cst_14 {dimension_numbers = #tpu.dot_dimension_numbers<[1], [0], [0], [1], [0, 0, 1, 1], [], []>} : vector<16x64xbf16>, vector<64x128xbf16>, vector<16x128xf32> -> vector<16x128xf32>
    %13 = arith.truncf %5 : vector<16x64xf32> to vector<16x64xbf16>
    %c0_15 = arith.constant 0 : index
    %c0_16 = arith.constant 0 : index
    %14 = vector.load %arg7[%c0_15, %c0_16] : memref<64x128xbf16, #tpu.memory_space<vmem>>, vector<64x128xbf16>
    %cst_17 = arith.constant dense<0.000000e+00> : vector<16x128xf32>
    %15 = tpu.matmul %13, %14, %cst_17 {dimension_numbers = #tpu.dot_dimension_numbers<[1], [0], [0], [1], [0, 0, 1, 1], [], []>} : vector<16x64xbf16>, vector<64x128xbf16>, vector<16x128xf32> -> vector<16x128xf32>
    %c0_18 = arith.constant 0 : index
    %c0_19 = arith.constant 0 : index
    %16 = vector.load %arg8[%c0_18, %c0_19] : memref<1x64xf32, #tpu.memory_space<vmem>>, vector<1x64xf32>
    %c0_20 = arith.constant 0 : index
    %c0_21 = arith.constant 0 : index
    %17 = vector.load %arg9[%c0_20, %c0_21] : memref<1x64xf32, #tpu.memory_space<vmem>>, vector<1x64xf32>
    %c0_22 = arith.constant 0 : index
    %c0_23 = arith.constant 0 : index
    %18 = vector.load %arg10[%c0_22, %c0_23] : memref<1x64xf32, #tpu.memory_space<vmem>>, vector<1x64xf32>
    %c0_24 = arith.constant 0 : index
    %c0_25 = arith.constant 0 : index
    %19 = vector.load %arg11[%c0_24, %c0_25] : memref<1x64xf32, #tpu.memory_space<vmem>>, vector<1x64xf32>
    %20 = vector.extract_strided_slice %9 {offsets = [0, 0], sizes = [16, 64], strides = [1, 1]} : vector<16x192xf32> to vector<16x64xf32>
    %cst_26 = arith.constant dense<0.000000e+00> : vector<16x64xf32>
    %21 = tpu.matmul %20, %6, %cst_26 {dimension_numbers = #tpu.dot_dimension_numbers<[1], [0], [0], [1], [0, 0, 1, 1], [], []>} : vector<16x64xf32>, vector<64x64xf32>, vector<16x64xf32> -> vector<16x64xf32>
    %22 = arith.subf %20, %21 : vector<16x64xf32>
    %23 = arith.mulf %22, %22 : vector<16x64xf32>
    %cst_27 = arith.constant dense<0.000000e+00> : vector<16x64xf32>
    %24 = tpu.matmul %23, %6, %cst_27 {dimension_numbers = #tpu.dot_dimension_numbers<[1], [0], [0], [1], [0, 0, 1, 1], [], []>} : vector<16x64xf32>, vector<64x64xf32>, vector<16x64xf32> -> vector<16x64xf32>
    %cst_28 = arith.constant 9.99999974E-6 : f32
    %25 = vector.broadcast %cst_28 : f32 to vector<16x64xf32>
    %26 = arith.addf %24, %25 : vector<16x64xf32>
    %27 = math.rsqrt %26 : vector<16x64xf32>
    %28 = arith.mulf %22, %27 : vector<16x64xf32>
    %29 = vector.broadcast %16 : vector<1x64xf32> to vector<16x64xf32>
    %30 = arith.mulf %28, %29 : vector<16x64xf32>
    %31 = vector.broadcast %17 : vector<1x64xf32> to vector<16x64xf32>
    %32 = arith.addf %30, %31 : vector<16x64xf32>
    %cst_29 = arith.constant 1.250000e-01 : f32
    %33 = vector.broadcast %cst_29 : f32 to vector<16x64xf32>
    %34 = arith.mulf %32, %33 : vector<16x64xf32>
    %35 = vector.extract_strided_slice %9 {offsets = [0, 64], sizes = [16, 64], strides = [1, 1]} : vector<16x192xf32> to vector<16x64xf32>
    %cst_30 = arith.constant dense<0.000000e+00> : vector<16x64xf32>
    %36 = tpu.matmul %35, %6, %cst_30 {dimension_numbers = #tpu.dot_dimension_numbers<[1], [0], [0], [1], [0, 0, 1, 1], [], []>} : vector<16x64xf32>, vector<64x64xf32>, vector<16x64xf32> -> vector<16x64xf32>
    %37 = arith.subf %35, %36 : vector<16x64xf32>
    %38 = arith.mulf %37, %37 : vector<16x64xf32>
    %cst_31 = arith.constant dense<0.000000e+00> : vector<16x64xf32>
    %39 = tpu.matmul %38, %6, %cst_31 {dimension_numbers = #tpu.dot_dimension_numbers<[1], [0], [0], [1], [0, 0, 1, 1], [], []>} : vector<16x64xf32>, vector<64x64xf32>, vector<16x64xf32> -> vector<16x64xf32>
    %cst_32 = arith.constant 9.99999974E-6 : f32
    %40 = vector.broadcast %cst_32 : f32 to vector<16x64xf32>
    %41 = arith.addf %39, %40 : vector<16x64xf32>
    %42 = math.rsqrt %41 : vector<16x64xf32>
    %43 = arith.mulf %37, %42 : vector<16x64xf32>
    %44 = vector.broadcast %18 : vector<1x64xf32> to vector<16x64xf32>
    %45 = arith.mulf %43, %44 : vector<16x64xf32>
    %46 = vector.broadcast %19 : vector<1x64xf32> to vector<16x64xf32>
    %47 = arith.addf %45, %46 : vector<16x64xf32>
    %48 = arith.truncf %47 : vector<16x64xf32> to vector<16x64xbf16>
    %c0_33 = arith.constant 0 : index
    %c0_34 = arith.constant 0 : index
    %49 = vector.load %arg23[%c0_33, %c0_34] : memref<48x64xbf16, #tpu.memory_space<vmem>>, vector<16x64xbf16>
    tpu.vector_store %arg23[%c0_33, %c0_34], %48 {strides = array<i32>} : memref<48x64xbf16, #tpu.memory_space<vmem>>, vector<16x64xbf16>,
    %50 = vector.extract_strided_slice %12 {offsets = [0, 0], sizes = [16, 64], strides = [1, 1]} : vector<16x128xf32> to vector<16x64xf32>
    %cst_35 = arith.constant dense<0.000000e+00> : vector<16x64xf32>
    %51 = tpu.matmul %50, %6, %cst_35 {dimension_numbers = #tpu.dot_dimension_numbers<[1], [0], [0], [1], [0, 0, 1, 1], [], []>} : vector<16x64xf32>, vector<64x64xf32>, vector<16x64xf32> -> vector<16x64xf32>
    %52 = arith.subf %50, %51 : vector<16x64xf32>
    %53 = arith.mulf %52, %52 : vector<16x64xf32>
    %cst_36 = arith.constant dense<0.000000e+00> : vector<16x64xf32>
    %54 = tpu.matmul %53, %6, %cst_36 {dimension_numbers = #tpu.dot_dimension_numbers<[1], [0], [0], [1], [0, 0, 1, 1], [], []>} : vector<16x64xf32>, vector<64x64xf32>, vector<16x64xf32> -> vector<16x64xf32>
    %cst_37 = arith.constant 9.99999974E-6 : f32
    %55 = vector.broadcast %cst_37 : f32 to vector<16x64xf32>
    %56 = arith.addf %54, %55 : vector<16x64xf32>
    %57 = math.rsqrt %56 : vector<16x64xf32>
    %58 = arith.mulf %52, %57 : vector<16x64xf32>
    %59 = vector.broadcast %18 : vector<1x64xf32> to vector<16x64xf32>
    %60 = arith.mulf %58, %59 : vector<16x64xf32>
    %61 = vector.broadcast %19 : vector<1x64xf32> to vector<16x64xf32>
    %62 = arith.addf %60, %61 : vector<16x64xf32>
    %63 = arith.truncf %62 : vector<16x64xf32> to vector<16x64xbf16>
    %c16 = arith.constant 16 : index
    %c0_38 = arith.constant 0 : index
    %64 = vector.load %arg23[%c16, %c0_38] : memref<48x64xbf16, #tpu.memory_space<vmem>>, vector<16x64xbf16>
    tpu.vector_store %arg23[%c16, %c0_38], %63 {strides = array<i32>} : memref<48x64xbf16, #tpu.memory_space<vmem>>, vector<16x64xbf16>,
    %65 = vector.extract_strided_slice %15 {offsets = [0, 0], sizes = [16, 64], strides = [1, 1]} : vector<16x128xf32> to vector<16x64xf32>
    %cst_39 = arith.constant dense<0.000000e+00> : vector<16x64xf32>
    %66 = tpu.matmul %65, %6, %cst_39 {dimension_numbers = #tpu.dot_dimension_numbers<[1], [0], [0], [1], [0, 0, 1, 1], [], []>} : vector<16x64xf32>, vector<64x64xf32>, vector<16x64xf32> -> vector<16x64xf32>
    %67 = arith.subf %65, %66 : vector<16x64xf32>
    %68 = arith.mulf %67, %67 : vector<16x64xf32>
    %cst_40 = arith.constant dense<0.000000e+00> : vector<16x64xf32>
    %69 = tpu.matmul %68, %6, %cst_40 {dimension_numbers = #tpu.dot_dimension_numbers<[1], [0], [0], [1], [0, 0, 1, 1], [], []>} : vector<16x64xf32>, vector<64x64xf32>, vector<16x64xf32> -> vector<16x64xf32>
    %cst_41 = arith.constant 9.99999974E-6 : f32
    %70 = vector.broadcast %cst_41 : f32 to vector<16x64xf32>
    %71 = arith.addf %69, %70 : vector<16x64xf32>
    %72 = math.rsqrt %71 : vector<16x64xf32>
    %73 = arith.mulf %67, %72 : vector<16x64xf32>
    %74 = vector.broadcast %18 : vector<1x64xf32> to vector<16x64xf32>
    %75 = arith.mulf %73, %74 : vector<16x64xf32>
    %76 = vector.broadcast %19 : vector<1x64xf32> to vector<16x64xf32>
    %77 = arith.addf %75, %76 : vector<16x64xf32>
    %78 = arith.truncf %77 : vector<16x64xf32> to vector<16x64xbf16>
    %c32 = arith.constant 32 : index
    %c0_42 = arith.constant 0 : index
    %79 = vector.load %arg23[%c32, %c0_42] : memref<48x64xbf16, #tpu.memory_space<vmem>>, vector<16x64xbf16>
    tpu.vector_store %arg23[%c32, %c0_42], %78 {strides = array<i32>} : memref<48x64xbf16, #tpu.memory_space<vmem>>, vector<16x64xbf16>,
    %80 = vector.extract_strided_slice %9 {offsets = [0, 128], sizes = [16, 64], strides = [1, 1]} : vector<16x192xf32> to vector<16x64xf32>
    %81 = arith.truncf %80 : vector<16x64xf32> to vector<16x64xbf16>
    %c0_43 = arith.constant 0 : index
    %c0_44 = arith.constant 0 : index
    %82 = vector.load %arg24[%c0_43, %c0_44] : memref<48x64xbf16, #tpu.memory_space<vmem>>, vector<16x64xbf16>
    tpu.vector_store %arg24[%c0_43, %c0_44], %81 {strides = array<i32>} : memref<48x64xbf16, #tpu.memory_space<vmem>>, vector<16x64xbf16>,
    %83 = vector.extract_strided_slice %12 {offsets = [0, 64], sizes = [16, 64], strides = [1, 1]} : vector<16x128xf32> to vector<16x64xf32>
    %84 = arith.truncf %83 : vector<16x64xf32> to vector<16x64xbf16>
    %c16_45 = arith.constant 16 : index
    %c0_46 = arith.constant 0 : index
    %85 = vector.load %arg24[%c16_45, %c0_46] : memref<48x64xbf16, #tpu.memory_space<vmem>>, vector<16x64xbf16>
    tpu.vector_store %arg24[%c16_45, %c0_46], %84 {strides = array<i32>} : memref<48x64xbf16, #tpu.memory_space<vmem>>, vector<16x64xbf16>,
    %86 = vector.extract_strided_slice %15 {offsets = [0, 64], sizes = [16, 64], strides = [1, 1]} : vector<16x128xf32> to vector<16x64xf32>
    %87 = arith.truncf %86 : vector<16x64xf32> to vector<16x64xbf16>
    %c32_47 = arith.constant 32 : index
    %c0_48 = arith.constant 0 : index
    %88 = vector.load %arg24[%c32_47, %c0_48] : memref<48x64xbf16, #tpu.memory_space<vmem>>, vector<16x64xbf16>
    tpu.vector_store %arg24[%c32_47, %c0_48], %87 {strides = array<i32>} : memref<48x64xbf16, #tpu.memory_space<vmem>>, vector<16x64xbf16>,
    %cst_49 = arith.constant 0.000000e+00 : f32
    %89 = vector.broadcast %cst_49 : f32 to vector<16x64xf32>
    %90 = vector.extract_strided_slice %34 {offsets = [0, 0], sizes = [16, 16], strides = [1, 1]} : vector<16x64xf32> to vector<16x16xf32>
    %91 = arith.truncf %90 : vector<16x16xf32> to vector<16x16xbf16>
    %c0_50 = arith.constant 0 : index
    %c0_51 = arith.constant 0 : index
    %92 = vector.load %arg23[%c0_50, %c0_51] : memref<48x64xbf16, #tpu.memory_space<vmem>>, vector<48x16xbf16>
    %c0_52 = arith.constant 0 : index
    %c0_53 = arith.constant 0 : index
    %93 = vector.load %arg24[%c0_52, %c0_53] : memref<48x64xbf16, #tpu.memory_space<vmem>>, vector<48x16xbf16>
    "tpu.trace_start"() <{level = 10 : i32, message = "sd,td->st"}> : () -> ()
    %cst_54 = arith.constant dense<0.000000e+00> : vector<16x48xf32>
    %94 = tpu.matmul %91, %92, %cst_54 {dimension_numbers = #tpu.dot_dimension_numbers<[1], [1], [0], [0], [0, 0, 1, 0], [], []>} : vector<16x16xbf16>, vector<48x16xbf16>, vector<16x48xf32> -> vector<16x48xf32>
    "tpu.trace_stop"() : () -> ()
    %cst_55 = arith.constant dense<0xFF800000> : vector<16xf32>
    %95 = vector.multi_reduction <maximumf>, %94, %cst_55 [1] : vector<16x48xf32> to vector<16xf32>
    %96 = vector.shape_cast %95 : vector<16xf32> to vector<16x1xf32>
    %97 = vector.broadcast %96 : vector<16x1xf32> to vector<16x48xf32>
    %98 = arith.subf %94, %97 : vector<16x48xf32>
    %99 = math.exp %98 : vector<16x48xf32>
    %cst_56 = arith.constant dense<0.000000e+00> : vector<16xf32>
    %100 = vector.multi_reduction <add>, %99, %cst_56 [1] : vector<16x48xf32> to vector<16xf32>
    %101 = vector.shape_cast %100 : vector<16xf32> to vector<16x1xf32>
    %102 = tpu.reciprocal %101 {approx = true} : vector<16x1xf32> -> vector<16x1xf32>
    %103 = vector.broadcast %102 : vector<16x1xf32> to vector<16x48xf32>
    %104 = arith.mulf %99, %103 : vector<16x48xf32>
    %105 = arith.truncf %104 : vector<16x48xf32> to vector<16x48xbf16>
    %cst_57 = arith.constant dense<0.000000e+00> : vector<16x16xf32>
    %106 = tpu.matmul %105, %93, %cst_57 {dimension_numbers = #tpu.dot_dimension_numbers<[1], [0], [0], [1], [0, 0, 1, 1], [], []>} : vector<16x48xbf16>, vector<48x16xbf16>, vector<16x16xf32> -> vector<16x16xf32>
    %107 = arith.truncf %106 : vector<16x16xf32> to vector<16x16xbf16>
    %c0_58 = arith.constant 0 : index
    %c0_59 = arith.constant 0 : index
    %108 = vector.load %arg12[%c0_58, %c0_59] : memref<64x64xbf16, #tpu.memory_space<vmem>>, vector<16x64xbf16>
    %cst_60 = arith.constant dense<0.000000e+00> : vector<16x64xf32>
    %109 = tpu.matmul %107, %108, %cst_60 {dimension_numbers = #tpu.dot_dimension_numbers<[1], [0], [0], [1], [0, 0, 1, 1], [], []>} : vector<16x16xbf16>, vector<16x64xbf16>, vector<16x64xf32> -> vector<16x64xf32>
    %110 = arith.addf %89, %109 : vector<16x64xf32>
    %111 = vector.extract_strided_slice %34 {offsets = [0, 16], sizes = [16, 16], strides = [1, 1]} : vector<16x64xf32> to vector<16x16xf32>
    %112 = arith.truncf %111 : vector<16x16xf32> to vector<16x16xbf16>
    %c0_61 = arith.constant 0 : index
    %c16_62 = arith.constant 16 : index
    %113 = vector.load %arg23[%c0_61, %c16_62] : memref<48x64xbf16, #tpu.memory_space<vmem>>, vector<48x16xbf16>
    %c0_63 = arith.constant 0 : index
    %c16_64 = arith.constant 16 : index
    %114 = vector.load %arg24[%c0_63, %c16_64] : memref<48x64xbf16, #tpu.memory_space<vmem>>, vector<48x16xbf16>
    "tpu.trace_start"() <{level = 10 : i32, message = "sd,td->st"}> : () -> ()
    %cst_65 = arith.constant dense<0.000000e+00> : vector<16x48xf32>
    %115 = tpu.matmul %112, %113, %cst_65 {dimension_numbers = #tpu.dot_dimension_numbers<[1], [1], [0], [0], [0, 0, 1, 0], [], []>} : vector<16x16xbf16>, vector<48x16xbf16>, vector<16x48xf32> -> vector<16x48xf32>
    "tpu.trace_stop"() : () -> ()
    %cst_66 = arith.constant dense<0xFF800000> : vector<16xf32>
    %116 = vector.multi_reduction <maximumf>, %115, %cst_66 [1] : vector<16x48xf32> to vector<16xf32>
    %117 = vector.shape_cast %116 : vector<16xf32> to vector<16x1xf32>
    %118 = vector.broadcast %117 : vector<16x1xf32> to vector<16x48xf32>
    %119 = arith.subf %115, %118 : vector<16x48xf32>
    %120 = math.exp %119 : vector<16x48xf32>
    %cst_67 = arith.constant dense<0.000000e+00> : vector<16xf32>
    %121 = vector.multi_reduction <add>, %120, %cst_67 [1] : vector<16x48xf32> to vector<16xf32>
    %122 = vector.shape_cast %121 : vector<16xf32> to vector<16x1xf32>
    %123 = tpu.reciprocal %122 {approx = true} : vector<16x1xf32> -> vector<16x1xf32>
    %124 = vector.broadcast %123 : vector<16x1xf32> to vector<16x48xf32>
    %125 = arith.mulf %120, %124 : vector<16x48xf32>
    %126 = arith.truncf %125 : vector<16x48xf32> to vector<16x48xbf16>
    %cst_68 = arith.constant dense<0.000000e+00> : vector<16x16xf32>
    %127 = tpu.matmul %126, %114, %cst_68 {dimension_numbers = #tpu.dot_dimension_numbers<[1], [0], [0], [1], [0, 0, 1, 1], [], []>} : vector<16x48xbf16>, vector<48x16xbf16>, vector<16x16xf32> -> vector<16x16xf32>
    %128 = arith.truncf %127 : vector<16x16xf32> to vector<16x16xbf16>
    %c16_69 = arith.constant 16 : index
    %c0_70 = arith.constant 0 : index
    %129 = vector.load %arg12[%c16_69, %c0_70] : memref<64x64xbf16, #tpu.memory_space<vmem>>, vector<16x64xbf16>
    %cst_71 = arith.constant dense<0.000000e+00> : vector<16x64xf32>
    %130 = tpu.matmul %128, %129, %cst_71 {dimension_numbers = #tpu.dot_dimension_numbers<[1], [0], [0], [1], [0, 0, 1, 1], [], []>} : vector<16x16xbf16>, vector<16x64xbf16>, vector<16x64xf32> -> vector<16x64xf32>
    %131 = arith.addf %110, %130 : vector<16x64xf32>
    %132 = vector.extract_strided_slice %34 {offsets = [0, 32], sizes = [16, 16], strides = [1, 1]} : vector<16x64xf32> to vector<16x16xf32>
    %133 = arith.truncf %132 : vector<16x16xf32> to vector<16x16xbf16>
    %c0_72 = arith.constant 0 : index
    %c32_73 = arith.constant 32 : index
    %134 = vector.load %arg23[%c0_72, %c32_73] : memref<48x64xbf16, #tpu.memory_space<vmem>>, vector<48x16xbf16>
    %c0_74 = arith.constant 0 : index
    %c32_75 = arith.constant 32 : index
    %135 = vector.load %arg24[%c0_74, %c32_75] : memref<48x64xbf16, #tpu.memory_space<vmem>>, vector<48x16xbf16>
    "tpu.trace_start"() <{level = 10 : i32, message = "sd,td->st"}> : () -> ()
    %cst_76 = arith.constant dense<0.000000e+00> : vector<16x48xf32>
    %136 = tpu.matmul %133, %134, %cst_76 {dimension_numbers = #tpu.dot_dimension_numbers<[1], [1], [0], [0], [0, 0, 1, 0], [], []>} : vector<16x16xbf16>, vector<48x16xbf16>, vector<16x48xf32> -> vector<16x48xf32>
    "tpu.trace_stop"() : () -> ()
    %cst_77 = arith.constant dense<0xFF800000> : vector<16xf32>
    %137 = vector.multi_reduction <maximumf>, %136, %cst_77 [1] : vector<16x48xf32> to vector<16xf32>
    %138 = vector.shape_cast %137 : vector<16xf32> to vector<16x1xf32>
    %139 = vector.broadcast %138 : vector<16x1xf32> to vector<16x48xf32>
    %140 = arith.subf %136, %139 : vector<16x48xf32>
    %141 = math.exp %140 : vector<16x48xf32>
    %cst_78 = arith.constant dense<0.000000e+00> : vector<16xf32>
    %142 = vector.multi_reduction <add>, %141, %cst_78 [1] : vector<16x48xf32> to vector<16xf32>
    %143 = vector.shape_cast %142 : vector<16xf32> to vector<16x1xf32>
    %144 = tpu.reciprocal %143 {approx = true} : vector<16x1xf32> -> vector<16x1xf32>
    %145 = vector.broadcast %144 : vector<16x1xf32> to vector<16x48xf32>
    %146 = arith.mulf %141, %145 : vector<16x48xf32>
    %147 = arith.truncf %146 : vector<16x48xf32> to vector<16x48xbf16>
    %cst_79 = arith.constant dense<0.000000e+00> : vector<16x16xf32>
    %148 = tpu.matmul %147, %135, %cst_79 {dimension_numbers = #tpu.dot_dimension_numbers<[1], [0], [0], [1], [0, 0, 1, 1], [], []>} : vector<16x48xbf16>, vector<48x16xbf16>, vector<16x16xf32> -> vector<16x16xf32>
    %149 = arith.truncf %148 : vector<16x16xf32> to vector<16x16xbf16>
    %c32_80 = arith.constant 32 : index
    %c0_81 = arith.constant 0 : index
    %150 = vector.load %arg12[%c32_80, %c0_81] : memref<64x64xbf16, #tpu.memory_space<vmem>>, vector<16x64xbf16>
    %cst_82 = arith.constant dense<0.000000e+00> : vector<16x64xf32>
    %151 = tpu.matmul %149, %150, %cst_82 {dimension_numbers = #tpu.dot_dimension_numbers<[1], [0], [0], [1], [0, 0, 1, 1], [], []>} : vector<16x16xbf16>, vector<16x64xbf16>, vector<16x64xf32> -> vector<16x64xf32>
    %152 = arith.addf %131, %151 : vector<16x64xf32>
    %153 = vector.extract_strided_slice %34 {offsets = [0, 48], sizes = [16, 16], strides = [1, 1]} : vector<16x64xf32> to vector<16x16xf32>
    %154 = arith.truncf %153 : vector<16x16xf32> to vector<16x16xbf16>
    %c0_83 = arith.constant 0 : index
    %c48 = arith.constant 48 : index
    %155 = vector.load %arg23[%c0_83, %c48] : memref<48x64xbf16, #tpu.memory_space<vmem>>, vector<48x16xbf16>
    %c0_84 = arith.constant 0 : index
    %c48_85 = arith.constant 48 : index
    %156 = vector.load %arg24[%c0_84, %c48_85] : memref<48x64xbf16, #tpu.memory_space<vmem>>, vector<48x16xbf16>
    "tpu.trace_start"() <{level = 10 : i32, message = "sd,td->st"}> : () -> ()
    %cst_86 = arith.constant dense<0.000000e+00> : vector<16x48xf32>
    %157 = tpu.matmul %154, %155, %cst_86 {dimension_numbers = #tpu.dot_dimension_numbers<[1], [1], [0], [0], [0, 0, 1, 0], [], []>} : vector<16x16xbf16>, vector<48x16xbf16>, vector<16x48xf32> -> vector<16x48xf32>
    "tpu.trace_stop"() : () -> ()
    %cst_87 = arith.constant dense<0xFF800000> : vector<16xf32>
    %158 = vector.multi_reduction <maximumf>, %157, %cst_87 [1] : vector<16x48xf32> to vector<16xf32>
    %159 = vector.shape_cast %158 : vector<16xf32> to vector<16x1xf32>
    %160 = vector.broadcast %159 : vector<16x1xf32> to vector<16x48xf32>
    %161 = arith.subf %157, %160 : vector<16x48xf32>
    %162 = math.exp %161 : vector<16x48xf32>
    %cst_88 = arith.constant dense<0.000000e+00> : vector<16xf32>
    %163 = vector.multi_reduction <add>, %162, %cst_88 [1] : vector<16x48xf32> to vector<16xf32>
    %164 = vector.shape_cast %163 : vector<16xf32> to vector<16x1xf32>
    %165 = tpu.reciprocal %164 {approx = true} : vector<16x1xf32> -> vector<16x1xf32>
    %166 = vector.broadcast %165 : vector<16x1xf32> to vector<16x48xf32>
    %167 = arith.mulf %162, %166 : vector<16x48xf32>
    %168 = arith.truncf %167 : vector<16x48xf32> to vector<16x48xbf16>
    %cst_89 = arith.constant dense<0.000000e+00> : vector<16x16xf32>
    %169 = tpu.matmul %168, %156, %cst_89 {dimension_numbers = #tpu.dot_dimension_numbers<[1], [0], [0], [1], [0, 0, 1, 1], [], []>} : vector<16x48xbf16>, vector<48x16xbf16>, vector<16x16xf32> -> vector<16x16xf32>
    %170 = arith.truncf %169 : vector<16x16xf32> to vector<16x16xbf16>
    %c48_90 = arith.constant 48 : index
    %c0_91 = arith.constant 0 : index
    %171 = vector.load %arg12[%c48_90, %c0_91] : memref<64x64xbf16, #tpu.memory_space<vmem>>, vector<16x64xbf16>
    %cst_92 = arith.constant dense<0.000000e+00> : vector<16x64xf32>
    %172 = tpu.matmul %170, %171, %cst_92 {dimension_numbers = #tpu.dot_dimension_numbers<[1], [0], [0], [1], [0, 0, 1, 1], [], []>} : vector<16x16xbf16>, vector<16x64xbf16>, vector<16x64xf32> -> vector<16x64xf32>
    %173 = arith.addf %152, %172 : vector<16x64xf32>
    %c0_93 = arith.constant 0 : index
    %c0_94 = arith.constant 0 : index
    %174 = vector.load %arg13[%c0_93, %c0_94] : memref<1x64xf32, #tpu.memory_space<vmem>>, vector<1x64xf32>
    %175 = vector.broadcast %174 : vector<1x64xf32> to vector<16x64xf32>
    %176 = arith.addf %173, %175 : vector<16x64xf32>
    %177 = arith.addf %1, %176 : vector<16x64xf32>
    %c0_95 = arith.constant 0 : index
    %c0_96 = arith.constant 0 : index
    %178 = vector.load %arg14[%c0_95, %c0_96] : memref<1x64xf32, #tpu.memory_space<vmem>>, vector<1x64xf32>
    %c0_97 = arith.constant 0 : index
    %c0_98 = arith.constant 0 : index
    %179 = vector.load %arg15[%c0_97, %c0_98] : memref<1x64xf32, #tpu.memory_space<vmem>>, vector<1x64xf32>
    %cst_99 = arith.constant dense<0.000000e+00> : vector<16xf32>
    %180 = vector.multi_reduction <add>, %177, %cst_99 [1] : vector<16x64xf32> to vector<16xf32>
    %181 = vector.shape_cast %180 : vector<16xf32> to vector<16x1xf32>
    %cst_100 = arith.constant 6.400000e+01 : f32
    %182 = vector.broadcast %cst_100 : f32 to vector<16x1xf32>
    %183 = arith.divf %181, %182 : vector<16x1xf32>
    %184 = vector.broadcast %183 : vector<16x1xf32> to vector<16x64xf32>
    %185 = arith.subf %177, %184 : vector<16x64xf32>
    %186 = arith.mulf %185, %185 : vector<16x64xf32>
    %cst_101 = arith.constant dense<0.000000e+00> : vector<16xf32>
    %187 = vector.multi_reduction <add>, %186, %cst_101 [1] : vector<16x64xf32> to vector<16xf32>
    %188 = vector.shape_cast %187 : vector<16xf32> to vector<16x1xf32>
    %cst_102 = arith.constant 6.400000e+01 : f32
    %189 = vector.broadcast %cst_102 : f32 to vector<16x1xf32>
    %190 = arith.divf %188, %189 : vector<16x1xf32>
    %cst_103 = arith.constant 9.99999974E-6 : f32
    %191 = vector.broadcast %cst_103 : f32 to vector<16x1xf32>
    %192 = arith.addf %190, %191 : vector<16x1xf32>
    %193 = math.rsqrt %192 : vector<16x1xf32>
    %194 = vector.broadcast %193 : vector<16x1xf32> to vector<16x64xf32>
    %195 = arith.mulf %185, %194 : vector<16x64xf32>
    %196 = vector.broadcast %178 : vector<1x64xf32> to vector<16x64xf32>
    %197 = arith.mulf %195, %196 : vector<16x64xf32>
    %198 = vector.broadcast %179 : vector<1x64xf32> to vector<16x64xf32>
    %199 = arith.addf %197, %198 : vector<16x64xf32>
    %200 = arith.truncf %199 : vector<16x64xf32> to vector<16x64xbf16>
    %c0_104 = arith.constant 0 : index
    %c0_105 = arith.constant 0 : index
    %201 = vector.load %arg16[%c0_104, %c0_105] : memref<64x64xbf16, #tpu.memory_space<vmem>>, vector<64x64xbf16>
    %cst_106 = arith.constant dense<0.000000e+00> : vector<16x64xf32>
    %202 = tpu.matmul %200, %201, %cst_106 {dimension_numbers = #tpu.dot_dimension_numbers<[1], [0], [0], [1], [0, 0, 1, 1], [], []>} : vector<16x64xbf16>, vector<64x64xbf16>, vector<16x64xf32> -> vector<16x64xf32>
    %c0_107 = arith.constant 0 : index
    %c0_108 = arith.constant 0 : index
    %203 = vector.load %arg17[%c0_107, %c0_108] : memref<1x64xf32, #tpu.memory_space<vmem>>, vector<1x64xf32>
    %204 = vector.broadcast %203 : vector<1x64xf32> to vector<16x64xf32>
    %205 = arith.addf %202, %204 : vector<16x64xf32>
    %cst_109 = arith.constant 0.000000e+00 : f32
    %206 = vector.broadcast %cst_109 : f32 to vector<16x64xf32>
    %207 = arith.maximumf %205, %206 : vector<16x64xf32>
    %208 = arith.truncf %207 : vector<16x64xf32> to vector<16x64xbf16>
    %c0_110 = arith.constant 0 : index
    %c0_111 = arith.constant 0 : index
    %209 = vector.load %arg18[%c0_110, %c0_111] : memref<64x64xbf16, #tpu.memory_space<vmem>>, vector<64x64xbf16>
    %cst_112 = arith.constant dense<0.000000e+00> : vector<16x64xf32>
    %210 = tpu.matmul %208, %209, %cst_112 {dimension_numbers = #tpu.dot_dimension_numbers<[1], [0], [0], [1], [0, 0, 1, 1], [], []>} : vector<16x64xbf16>, vector<64x64xbf16>, vector<16x64xf32> -> vector<16x64xf32>
    %c0_113 = arith.constant 0 : index
    %c0_114 = arith.constant 0 : index
    %211 = vector.load %arg19[%c0_113, %c0_114] : memref<1x64xf32, #tpu.memory_space<vmem>>, vector<1x64xf32>
    %212 = vector.broadcast %211 : vector<1x64xf32> to vector<16x64xf32>
    %213 = arith.addf %210, %212 : vector<16x64xf32>
    %214 = arith.addf %199, %213 : vector<16x64xf32>
    %c0_115 = arith.constant 0 : index
    %c0_116 = arith.constant 0 : index
    %215 = vector.load %arg20[%c0_115, %c0_116] : memref<1x64xf32, #tpu.memory_space<vmem>>, vector<1x64xf32>
    %c0_117 = arith.constant 0 : index
    %c0_118 = arith.constant 0 : index
    %216 = vector.load %arg21[%c0_117, %c0_118] : memref<1x64xf32, #tpu.memory_space<vmem>>, vector<1x64xf32>
    %cst_119 = arith.constant dense<0.000000e+00> : vector<16xf32>
    %217 = vector.multi_reduction <add>, %214, %cst_119 [1] : vector<16x64xf32> to vector<16xf32>
    %218 = vector.shape_cast %217 : vector<16xf32> to vector<16x1xf32>
    %cst_120 = arith.constant 6.400000e+01 : f32
    %219 = vector.broadcast %cst_120 : f32 to vector<16x1xf32>
    %220 = arith.divf %218, %219 : vector<16x1xf32>
    %221 = vector.broadcast %220 : vector<16x1xf32> to vector<16x64xf32>
    %222 = arith.subf %214, %221 : vector<16x64xf32>
    %223 = arith.mulf %222, %222 : vector<16x64xf32>
    %cst_121 = arith.constant dense<0.000000e+00> : vector<16xf32>
    %224 = vector.multi_reduction <add>, %223, %cst_121 [1] : vector<16x64xf32> to vector<16xf32>
    %225 = vector.shape_cast %224 : vector<16xf32> to vector<16x1xf32>
    %cst_122 = arith.constant 6.400000e+01 : f32
    %226 = vector.broadcast %cst_122 : f32 to vector<16x1xf32>
    %227 = arith.divf %225, %226 : vector<16x1xf32>
    %cst_123 = arith.constant 9.99999974E-6 : f32
    %228 = vector.broadcast %cst_123 : f32 to vector<16x1xf32>
    %229 = arith.addf %227, %228 : vector<16x1xf32>
    %230 = math.rsqrt %229 : vector<16x1xf32>
    %231 = vector.broadcast %230 : vector<16x1xf32> to vector<16x64xf32>
    %232 = arith.mulf %222, %231 : vector<16x64xf32>
    %233 = vector.broadcast %215 : vector<1x64xf32> to vector<16x64xf32>
    %234 = arith.mulf %232, %233 : vector<16x64xf32>
    %235 = vector.broadcast %216 : vector<1x64xf32> to vector<16x64xf32>
    %236 = arith.addf %234, %235 : vector<16x64xf32>
    %c0_124 = arith.constant 0 : index
    %c0_125 = arith.constant 0 : index
    %c0_126 = arith.constant 0 : index
    %237 = vector.load %arg22[%c0_124, %c0_125, %c0_126] : memref<1x16x64xf32, #tpu.memory_space<vmem>>, vector<1x16x64xf32>
    %238 = vector.shape_cast %237 : vector<1x16x64xf32> to vector<16x64xf32>
    %239 = vector.shape_cast %236 : vector<16x64xf32> to vector<1x16x64xf32>
    tpu.vector_store %arg22[%c0_124, %c0_125, %c0_126], %239 {strides = array<i32>} : memref<1x16x64xf32, #tpu.memory_space<vmem>>, vector<1x16x64xf32>,
    return
  }
  func.func @transform_0(%arg0: i32) -> (i32, i32, i32) {
    %c0_i32 = arith.constant 0 : i32
    %c0_i32_0 = arith.constant 0 : i32
    %c0_i32_1 = arith.constant 0 : i32
    return %arg0, %c0_i32, %c0_i32_0 : i32, i32, i32
  }
  func.func @transform_1(%arg0: i32) -> (i32, i32, i32) {
    %c0_i32 = arith.constant 0 : i32
    %c0_i32_0 = arith.constant 0 : i32
    %c0_i32_1 = arith.constant 0 : i32
    return %arg0, %c0_i32, %c0_i32_0 : i32, i32, i32
  }
  func.func @transform_2(%arg0: i32) -> (i32, i32, i32) {
    %c0_i32 = arith.constant 0 : i32
    %c0_i32_0 = arith.constant 0 : i32
    %c0_i32_1 = arith.constant 0 : i32
    return %arg0, %c0_i32, %c0_i32_0 : i32, i32, i32
  }
  func.func @transform_3(%arg0: i32) -> (i32, i32) {
    %c0_i32 = arith.constant 0 : i32
    %c0_i32_0 = arith.constant 0 : i32
    %c0_i32_1 = arith.constant 0 : i32
    return %c0_i32, %c0_i32_0 : i32, i32
  }
  func.func @transform_4(%arg0: i32) -> (i32, i32) {
    %c0_i32 = arith.constant 0 : i32
    %c0_i32_0 = arith.constant 0 : i32
    %c0_i32_1 = arith.constant 0 : i32
    return %c0_i32, %c0_i32_0 : i32, i32
  }
  func.func @transform_5(%arg0: i32) -> (i32, i32) {
    %c0_i32 = arith.constant 0 : i32
    %c0_i32_0 = arith.constant 0 : i32
    %c0_i32_1 = arith.constant 0 : i32
    return %c0_i32, %c0_i32_0 : i32, i32
  }
  func.func @transform_6(%arg0: i32) -> (i32, i32) {
    %c0_i32 = arith.constant 0 : i32
    %c0_i32_0 = arith.constant 0 : i32
    %c0_i32_1 = arith.constant 0 : i32
    return %c0_i32, %c0_i32_0 : i32, i32
  }
  func.func @transform_7(%arg0: i32) -> (i32, i32) {
    %c0_i32 = arith.constant 0 : i32
    %c0_i32_0 = arith.constant 0 : i32
    %c0_i32_1 = arith.constant 0 : i32
    return %c0_i32, %c0_i32_0 : i32, i32
  }
  func.func @transform_8(%arg0: i32) -> (i32, i32) {
    %c0_i32 = arith.constant 0 : i32
    %c0_i32_0 = arith.constant 0 : i32
    %c0_i32_1 = arith.constant 0 : i32
    return %c0_i32, %c0_i32_0 : i32, i32
  }
  func.func @transform_9(%arg0: i32) -> (i32, i32) {
    %c0_i32 = arith.constant 0 : i32
    %c0_i32_0 = arith.constant 0 : i32
    %c0_i32_1 = arith.constant 0 : i32
    return %c0_i32, %c0_i32_0 : i32, i32
  }
  func.func @transform_10(%arg0: i32) -> (i32, i32) {
    %c0_i32 = arith.constant 0 : i32
    %c0_i32_0 = arith.constant 0 : i32
    %c0_i32_1 = arith.constant 0 : i32
    return %c0_i32, %c0_i32_0 : i32, i32
  }
  func.func @transform_11(%arg0: i32) -> (i32, i32) {
    %c0_i32 = arith.constant 0 : i32
    %c0_i32_0 = arith.constant 0 : i32
    %c0_i32_1 = arith.constant 0 : i32
    return %c0_i32, %c0_i32_0 : i32, i32
  }
  func.func @transform_12(%arg0: i32) -> (i32, i32) {
    %c0_i32 = arith.constant 0 : i32
    %c0_i32_0 = arith.constant 0 : i32
    %c0_i32_1 = arith.constant 0 : i32
    return %c0_i32, %c0_i32_0 : i32, i32
  }
  func.func @transform_13(%arg0: i32) -> (i32, i32) {
    %c0_i32 = arith.constant 0 : i32
    %c0_i32_0 = arith.constant 0 : i32
    %c0_i32_1 = arith.constant 0 : i32
    return %c0_i32, %c0_i32_0 : i32, i32
  }
  func.func @transform_14(%arg0: i32) -> (i32, i32) {
    %c0_i32 = arith.constant 0 : i32
    %c0_i32_0 = arith.constant 0 : i32
    %c0_i32_1 = arith.constant 0 : i32
    return %c0_i32, %c0_i32_0 : i32, i32
  }
  func.func @transform_15(%arg0: i32) -> (i32, i32) {
    %c0_i32 = arith.constant 0 : i32
    %c0_i32_0 = arith.constant 0 : i32
    %c0_i32_1 = arith.constant 0 : i32
    return %c0_i32, %c0_i32_0 : i32, i32
  }
  func.func @transform_16(%arg0: i32) -> (i32, i32) {
    %c0_i32 = arith.constant 0 : i32
    %c0_i32_0 = arith.constant 0 : i32
    %c0_i32_1 = arith.constant 0 : i32
    return %c0_i32, %c0_i32_0 : i32, i32
  }
  func.func @transform_17(%arg0: i32) -> (i32, i32) {
    %c0_i32 = arith.constant 0 : i32
    %c0_i32_0 = arith.constant 0 : i32
    %c0_i32_1 = arith.constant 0 : i32
    return %c0_i32, %c0_i32_0 : i32, i32
  }
  func.func @transform_18(%arg0: i32) -> (i32, i32) {
    %c0_i32 = arith.constant 0 : i32
    %c0_i32_0 = arith.constant 0 : i32
    %c0_i32_1 = arith.constant 0 : i32
    return %c0_i32, %c0_i32_0 : i32, i32
  }
  func.func @transform_19(%arg0: i32) -> (i32, i32) {
    %c0_i32 = arith.constant 0 : i32
    %c0_i32_0 = arith.constant 0 : i32
    %c0_i32_1 = arith.constant 0 : i32
    return %c0_i32, %c0_i32_0 : i32, i32
  }
  func.func @transform_20(%arg0: i32) -> (i32, i32) {
    %c0_i32 = arith.constant 0 : i32
    %c0_i32_0 = arith.constant 0 : i32
    %c0_i32_1 = arith.constant 0 : i32
    return %c0_i32, %c0_i32_0 : i32, i32
  }
  func.func @transform_21(%arg0: i32) -> (i32, i32, i32) {
    %c0_i32 = arith.constant 0 : i32
    %c0_i32_0 = arith.constant 0 : i32
    %c0_i32_1 = arith.constant 0 : i32
    return %arg0, %c0_i32, %c0_i32_0 : i32, i32, i32
  }
}

</mosaic_0001>

<bundles_post_ra>
// kernel: tpu_custom_call.1
= control target key start
LH: loop header
LB: loop body
LE: loop exit
PB: predicated region body
PF: predicated region fallthrough
CT: control target
= control target key end

     0   :  { %s5965_s0 = inlined_call_operand.hbm [shape: f32[2,16,64], index: 0, kind: input, shape index: {}]   ;;  %s5966_s1 = inlined_call_operand.hbm [shape: f32[2,16,64], index: 1, kind: input, shape index: {}]   ;;  %s5967_s2 = inlined_call_operand.hbm [shape: f32[2,16,64], index: 2, kind: input, shape index: {}]   ;;  %s5968_s3 = inlined_call_operand.hbm [shape: f32[64,64], index: 3, kind: input, shape index: {}]   ;;  %s5969_s4 = inlined_call_operand.hbm [shape: bf16[64,192], index: 4, kind: input, shape index: {}]   ;;  %s5970_s5 = inlined_call_operand.hbm [shape: bf16[64,128], index: 5, kind: input, shape index: {}]   ;;  %s5971_s6 = inlined_call_operand.hbm [shape: bf16[64,128], index: 6, kind: input, shape index: {}]   ;;  %s5972_s7 = inlined_call_operand.hbm [shape: f32[1,64], index: 7, kind: input, shape index: {}]   ;;  %s5973_s8 = inlined_call_operand.hbm [shape: f32[1,64], index: 8, kind: input, shape index: {}]   ;;  %s5974_s9 = inlined_call_operand.hbm [shape: f32[1,64], index: 9, kind: input, shape index: {}]   ;;  %s5975_s10 = inlined_call_operand.hbm [shape: f32[1,64], index: 10, kind: input, shape index: {}]   ;;  %s5976_s11 = inlined_call_operand.vmem [shape: bf16[64,64], index: 11, kind: input, shape index: {}]   ;;  %s5977_s12 = inlined_call_operand.hbm [shape: f32[1,64], index: 12, kind: input, shape index: {}]   ;;  %s5978_s13 = inlined_call_operand.hbm [shape: f32[1,64], index: 13, kind: input, shape index: {}]   ;;  %s5979_s14 = inlined_call_operand.hbm [shape: f32[1,64], index: 14, kind: input, shape index: {}]   ;;  %s5980_s15 = inlined_call_operand.hbm [shape: bf16[64,64], index: 15, kind: input, shape index: {}]   ;;  %s5981_s16 = inlined_call_operand.hbm [shape: f32[1,64], index: 16, kind: input, shape index: {}]   ;;  %s5982_s17 = inlined_call_operand.vmem [shape: bf16[64,64], index: 17, kind: input, shape index: {}]   ;;  %s5983_s18 = inlined_call_operand.vmem [shape: f32[1,64], index: 18, kind: input, shape index: {}]   ;;  %s5984_s19 = inlined_call_operand.vmem [shape: f32[1,64], index: 19, kind: input, shape index: {}]   ;;  %s5985_s20 = inlined_call_operand.vmem [shape: f32[1,64], index: 20, kind: input, shape index: {}]   ;;  %s5986_s21 = inlined_call_operand.hbm [shape: f32[2,16,64], index: 21, kind: output, shape index: {}]  }
   0x1   :  { %6031 = sst [smem:[#allocation48_spill]] %s5965_s0 }
   0x2   :  { %6032 = sst [smem:[#allocation49_spill]] %s5966_s1 }
   0x3   :  { %6033 = sst [smem:[#allocation50_spill]] %s5967_s2 }
   0x4   :  { %6034 = sst [smem:[#allocation51_spill]] %s5968_s3 }
   0x5   :  { %6035 = sst [smem:[#allocation52_spill]] %s5969_s4 }
   0x6   :  { %6036 = sst [smem:[#allocation53_spill]] %s5970_s5 }
   0x7   :  { %6037 = sst [smem:[#allocation54_spill]] %s5971_s6 }
   0x8   :  { %6038 = sst [smem:[#allocation55_spill]] %s5972_s7 }
   0x9   :  { %6039 = sst [smem:[#allocation56_spill]] %s5973_s8 }
   0xa   :  { %6040 = sst [smem:[#allocation57_spill]] %s5974_s9 }
   0xb   :  { %6041 = sst [smem:[#allocation58_spill]] %s5976_s11 }
   0xc   :  { %6042 = sst [smem:[#allocation59_spill]] %s5977_s12 }
   0xd   :  { %6043 = sst [smem:[#allocation60_spill]] %s5979_s14 }
   0xe   :  { %6044 = sst [smem:[#allocation61_spill]] %s5980_s15 }
   0xf   :  { %6045 = sst [smem:[#allocation62_spill]] %s5981_s16 }
  0x10   :  { %6046 = sst [smem:[#allocation63_spill]] %s5982_s17 }
  0x11   :  { %6047 = sst [smem:[#allocation64_spill]] %s5983_s18 }
  0x12   :  { %6048 = sst [smem:[#allocation65_spill]] %s5984_s19 }
  0x13   :  { %6049 = sst [smem:[#allocation66_spill]] %s5985_s20 }
  0x14   :  { %6050 = sst [smem:[#allocation67_spill]] %s5986_s21 }
  0x15   :  { %26 = vsyncpa [#allocation5], 0 }
  0x16   :  { %28 = vsyncpa [#allocation5 + $0x1], 0 }
  0x17   :  { %29 = vsyncpa [#allocation8], 0 }
  0x18   :  { %31 = vsyncpa [#allocation8 + $0x1], 0 }
  0x19   :  { %32 = vsyncpa [#allocation11], 0 }
  0x1a   :  { %33 = vsyncpa [#allocation14], 0 }
  0x1b   :  { %34 = vsyncpa [#allocation17], 0 }
  0x1c   :  { %35 = vsyncpa [#allocation20], 0 }
  0x1d   :  { %36 = vsyncpa [#allocation23], 0 }
  0x1e   :  { %37 = vsyncpa [#allocation26], 0 }
  0x1f   :  { %38 = vsyncpa [#allocation29], 0 }
  0x20   :  { %39 = vsyncpa [#allocation6], 0 }
  0x21   :  { %41 = vsyncpa [#allocation6 + $0x1], 0  ;;  %s4969_s2 = smov 0   ;;  %s4971_s25 = smov 0  }
  0x22   :  { %s4973_s26 = smov 0   ;;  %s4975_s27 = smov 0  }
  0x23 LB: > { %6051 = sst [smem:[#allocation41_spill]] %s4815_s2  ;;  %s4829_s3 = smov [#allocation10]   ;;  %s4827_s27 = sphi %s4975_s27, %s6120_s27   ;;  %s4823_s26 = sphi %s4973_s26, %s6124_s26   ;;  %s4819_s25 = sphi %s4971_s25, %s6123_s25   ;;  %s4815_s2 = sphi %s4969_s2, %s6122_s2  }
  0x24   : > { %6052 = sst [smem:[#allocation42_spill]] %s4827_s27  ;;  %s546_s28 = sshll.u32 %s4829_s3, 4  ;;  %s4995_s28 = int_to_ptr.vmem [resolvable:$true] %s546_s28 }
  0x25   : > { %s4990_s29 = sadd.s32 4294967295, %s4827_s27   ;;  %p3290_p0 = scmp.ge.s32.totalorder %s4827_s27, 1 }
  0x26   : > { %p6001_p1 = scmp.eq.s32.totalorder %s4990_s29, 0  ;;  %p534_p2 = scmp.lt.s32.totalorder %s4827_s27, 3 }
  0x27   : > { %s4830_s4 = smov [#allocation13]   ;;  %s4831_s22 = smov [#allocation16]  }
  0x28   : > { %p4997_p3 = pnand %p3290_p0, %p534_p2  ;;  %s572_s30 = sshll.u32 %s4830_s4, 4  ;;  %s5010_s30 = int_to_ptr.vmem [resolvable:$true] %s572_s30 }
  0x29   : > { %s5012_s23 = sshll.u32 %s4831_s22, 4  ;;  %s6056_s3 = sld [smem:[#allocation51_spill]]  ;;  %s600_s23 = int_to_ptr.vmem [resolvable:$true] %s5012_s23 }
  0x2a   : > { %s6053_s0 = scalar_select %p4997_p3, 1, 0 }
  0x2b   : > { %p4045_p5 = pneg %p4997_p3 }
  0x2c   : > { %6054 = sst [smem:[#allocation43_spill]] %s6053_s0 }
  0x2d   : > { %p5006_p6 = pnand %p4045_p5, %p6001_p1 }
  0x2f   : > { %s6055_s5 = scalar_select %p5006_p6, 1, 0 }
  0x30   : > { %s4275_s21 = scalar_lea.hbm %s6056_s3, 1024  ;;  %p5022_p8 = pneg %p5006_p6 }
  0x31   : > { %p4276_p7 = scmp.ne.s32.totalorder %s6056_s3, %s4275_s21  ;;  %p4282_p11 = scmp.lt.u32.totalorder %s4275_s21, %s6056_s3 }
  0x32   : > { %s6057_s4 = scalar_select %p5022_p8, 1, 0 }
  0x33   : > { %p4278_p9 = pnand %p5022_p8, %p4276_p7 }
  0x35   : > { %p4279_p10 = pneg %p4278_p9 }
  0x37   : > { %p4284_p12 = pnand %p4282_p11, %p4279_p10 }
  0x39   : > { %4287 = shalt.err (!%p4284_p12)
}
  0x3a   : > { %s4288_s19 = scalar_lea.vmem %s4995_s28, 1024  ;;  %p4296_p5 = scmp.lt.s32.totalorder %s4995_s28, %s4995_s28 }
  0x3b   : > { %p4289_p13 = scmp.ne.s32.totalorder %s4995_s28, %s4288_s19  ;;  %p4297_p4 = scmp.lt.s32.totalorder %s4288_s19, %s4288_s19 }
  0x3d   : > { %p4291_p0 = pnand %p4289_p13, %p5022_p8  ;;  %p4298_p7 = por %p4297_p4, %p4296_p5 }
  0x3f   : > { %p4292_p2 = pneg %p4291_p0 }
  0x41   : > { %p4299_p9 = pnand %p4298_p7, %p4292_p2 }
  0x43   : > { %4302 = shalt.err (!%p4299_p9)
}
  0x44   : > { %s5999_s20 = smov 128   ;;  %s6007_s18 = smov 8  }
  0x45   : > { %4048 = dma.hbm_to_vmem [thread:$0]  (!%p5006_p6), %s6056_s3, 1024, %s4995_s28, [#allocation11], %s5999_s20, %s5999_s20, %s6007_s18  }
  0x46   : > { %s6058_s17 = sld [smem:[#allocation53_spill]] }
  0x4c   : > { %s4303_s19 = scalar_lea.hbm %s6058_s17, 512 }
  0x4d   : > { %p4304_p4 = scmp.ne.s32.totalorder %s6058_s17, %s4303_s19  ;;  %p4310_p12 = scmp.lt.u32.totalorder %s4303_s19, %s6058_s17 }
  0x4f   : > { %p4306_p10 = pnand %p4304_p4, %p5022_p8 }
  0x51   : > { %p4307_p11 = pneg %p4306_p10 }
  0x53   : > { %p4312_p13 = pnand %p4310_p12, %p4307_p11 }
  0x55   : > { %4315 = shalt.err (!%p4312_p13)
}
  0x56   : > { %s4316_s28 = scalar_lea.vmem %s5010_s30, 512  ;;  %p4324_p7 = scmp.lt.s32.totalorder %s5010_s30, %s5010_s30 }
  0x57   : > { %p4317_p0 = scmp.ne.s32.totalorder %s5010_s30, %s4316_s28  ;;  %p4325_p9 = scmp.lt.s32.totalorder %s4316_s28, %s4316_s28 }
  0x59   : > { %p4319_p2 = pnand %p4317_p0, %p5022_p8  ;;  %p4326_p4 = por %p4325_p9, %p4324_p7 }
  0x5b   : > { %p4320_p5 = pneg %p4319_p2 }
  0x5d   : > { %p4327_p10 = pnand %p4326_p4, %p4320_p5 }
  0x5f   : > { %4330 = shalt.err (!%p4327_p10)
}
  0x60   : > { %s6003_s11 = smov 64   ;;  %s6005_s15 = smov 4  }
  0x61   : > { %4054 = dma.hbm_to_vmem [thread:$0]  (!%p5006_p6), %s6058_s17, 512, %s5010_s30, [#allocation14], %s6003_s11, %s6003_s11, %s6005_s15  }
  0x62   : > { %s6059_s7 = sld [smem:[#allocation55_spill]] }
  0x68   : > { %s4331_s24 = scalar_lea.hbm %s6059_s7, 16 }
  0x69   : > { %p4332_p11 = scmp.ne.s32.totalorder %s6059_s7, %s4331_s24  ;;  %p4338_p0 = scmp.lt.u32.totalorder %s4331_s24, %s6059_s7 }
  0x6b   : > { %p4334_p12 = pnand %p4332_p11, %p5022_p8 }
  0x6d   : > { %p4335_p13 = pneg %p4334_p12 }
  0x6f   : > { %p4340_p2 = pnand %p4338_p0, %p4335_p13 }
  0x71   : > { %4343 = shalt.err (!%p4340_p2)
}
  0x72   : > { %s4344_s16 = scalar_lea.vmem %s600_s23, 16  ;;  %s4351_s30 = scalar_lea.vmem %s600_s23, 32 }
  0x73   : > { %p4345_p5 = scmp.ne.s32.totalorder %s600_s23, %s4344_s16  ;;  %p4352_p4 = scmp.lt.s32.totalorder %s600_s23, %s600_s23 }
  0x74   : > { %p4353_p10 = scmp.lt.s32.totalorder %s4351_s30, %s4344_s16 }
  0x75   : > { %p4347_p7 = pnand %p4345_p5, %p5022_p8 }
  0x76   : > { %p4354_p1 = por %p4353_p10, %p4352_p4 }
  0x77   : > { %p4348_p9 = pneg %p4347_p7 }
  0x79   : > { %p4355_p3 = pnand %p4354_p1, %p4348_p9 }
  0x7b   : > { %4358 = shalt.err (!%p4355_p3)
}
  0x7c   : > { %4060 = dma.hbm_to_vmem [thread:$0]  (!%p5006_p6), %s6059_s7, 16, %s600_s23, [#allocation17]  }
  0x7d   : > { %s4836_s20 = smov [#allocation19]   ;;  %s4837_s24 = smov [#allocation22]  }
  0x7e   : > { %s621_s1 = sshll.u32 %s4836_s20, 4  ;;  %s646_s22 = sshll.u32 %s4837_s24, 4  ;;  %s622_s1 = int_to_ptr.vmem [resolvable:$true] %s621_s1  ;;  %s647_s22 = int_to_ptr.vmem [resolvable:$true] %s646_s22 }
  0x7f   : > { %s6060_s9 = sld [smem:[#allocation57_spill]] }
  0x85   : > { %s4359_s11 = scalar_lea.hbm %s6060_s9, 16 }
  0x86   : > { %p4360_p1 = scmp.ne.s32.totalorder %s6060_s9, %s4359_s11  ;;  %p4366_p12 = scmp.lt.u32.totalorder %s4359_s11, %s6060_s9 }
  0x88   : > { %p4362_p3 = pnand %p4360_p1, %p5022_p8 }
  0x8a   : > { %p4363_p11 = pneg %p4362_p3 }
  0x8c   : > { %p4368_p13 = pnand %p4366_p12, %p4363_p11 }
  0x8e   : > { %4371 = shalt.err (!%p4368_p13)
}
  0x8f   : > { %s4372_s23 = scalar_lea.vmem %s622_s1, 16  ;;  %s4379_s21 = scalar_lea.vmem %s622_s1, 32 }
  0x90   : > { %p4373_p0 = scmp.ne.s32.totalorder %s622_s1, %s4372_s23  ;;  %p4380_p7 = scmp.lt.s32.totalorder %s622_s1, %s622_s1 }
  0x91   : > { %p4381_p9 = scmp.lt.s32.totalorder %s4379_s21, %s4372_s23 }
  0x92   : > { %p4375_p2 = pnand %p4373_p0, %p5022_p8 }
  0x93   : > { %p4382_p4 = por %p4381_p9, %p4380_p7 }
  0x94   : > { %p4376_p5 = pneg %p4375_p2 }
  0x96   : > { %p4383_p10 = pnand %p4382_p4, %p4376_p5 }
  0x98   : > { %4386 = shalt.err (!%p4383_p10)
}
  0x99   : > { %4066 = dma.hbm_to_vmem [thread:$0]  (!%p5006_p6), %s6060_s9, 16, %s622_s1, [#allocation20]  }
  0x9a   : > { %s6061_s12 = sld [smem:[#allocation59_spill]] }
  0xa0   : > { %s4387_s19 = scalar_lea.hbm %s6061_s12, 16 }
  0xa1   : > { %p4388_p1 = scmp.ne.s32.totalorder %s6061_s12, %s4387_s19  ;;  %p4394_p12 = scmp.lt.u32.totalorder %s4387_s19, %s6061_s12 }
  0xa3   : > { %p4390_p3 = pnand %p4388_p1, %p5022_p8 }
  0xa5   : > { %p4391_p11 = pneg %p4390_p3 }
  0xa7   : > { %p4396_p13 = pnand %p4394_p12, %p4391_p11 }
  0xa9   : > { %4399 = shalt.err (!%p4396_p13)
}
  0xaa   : > { %s4400_s23 = scalar_lea.vmem %s647_s22, 16  ;;  %s4407_s1 = scalar_lea.vmem %s647_s22, 32 }
  0xab   : > { %p4401_p0 = scmp.ne.s32.totalorder %s647_s22, %s4400_s23  ;;  %p4408_p7 = scmp.lt.s32.totalorder %s647_s22, %s647_s22 }
  0xac   : > { %p4409_p9 = scmp.lt.s32.totalorder %s4407_s1, %s4400_s23 }
  0xad   : > { %p4403_p2 = pnand %p4401_p0, %p5022_p8 }
  0xae   : > { %p4410_p4 = por %p4409_p9, %p4408_p7 }
  0xaf   : > { %p4404_p5 = pneg %p4403_p2 }
  0xb1   : > { %p4411_p10 = pnand %p4410_p4, %p4404_p5 }
  0xb3   : > { %4414 = shalt.err (!%p4411_p10)
}
  0xb4   : > { %4072 = dma.hbm_to_vmem [thread:$0]  (!%p5006_p6), %s6061_s12, 16, %s647_s22, [#allocation23]  }
  0xb5   : > { %s4838_s24 = smov [#allocation25]   ;;  %s6062_s14 = sld [smem:[#allocation60_spill]] }
  0xb6   : > { %s668_s11 = sshll.u32 %s4838_s24, 4  ;;  %s669_s11 = int_to_ptr.vmem [resolvable:$true] %s668_s11 }
  0xbb   : > { %s4415_s28 = scalar_lea.hbm %s6062_s14, 16 }
  0xbc   : > { %p4416_p1 = scmp.ne.s32.totalorder %s6062_s14, %s4415_s28  ;;  %p4422_p12 = scmp.lt.u32.totalorder %s4415_s28, %s6062_s14 }
  0xbe   : > { %p4418_p3 = pnand %p4416_p1, %p5022_p8 }
  0xc0   : > { %p4419_p11 = pneg %p4418_p3 }
  0xc2   : > { %p4424_p13 = pnand %p4422_p12, %p4419_p11 }
  0xc4   : > { %4427 = shalt.err (!%p4424_p13)
}
  0xc5   : > { %s4428_s22 = scalar_lea.vmem %s669_s11, 16  ;;  %s4435_s1 = scalar_lea.vmem %s669_s11, 32 }
  0xc6   : > { %p4429_p0 = scmp.ne.s32.totalorder %s669_s11, %s4428_s22  ;;  %p4436_p7 = scmp.lt.s32.totalorder %s669_s11, %s669_s11 }
  0xc7   : > { %p4437_p9 = scmp.lt.s32.totalorder %s4435_s1, %s4428_s22 }
  0xc8   : > { %p4431_p2 = pnand %p4429_p0, %p5022_p8 }
  0xc9   : > { %p4438_p4 = por %p4437_p9, %p4436_p7 }
  0xca   : > { %p4432_p5 = pneg %p4431_p2 }
  0xcc   : > { %p4439_p10 = pnand %p4438_p4, %p4432_p5 }
  0xce   : > { %4442 = shalt.err (!%p4439_p10)
}
  0xcf   : > { %4078 = dma.hbm_to_vmem [thread:$0]  (!%p5006_p6), %s6062_s14, 16, %s669_s11, [#allocation26]  }
  0xd0   : > { %s3289_s24 = sadd.s32 4294967294, %s4827_s27   ;;  %s5147_s15 = sadd.s32 1, %s4827_s27  }
  0xd1   : > { %6063 = sst [smem:[#allocation44_spill]] %s5147_s15  ;;  %s51_s19 = ssub.s32 %s4827_s27, %s5147_s15 }
  0xd2   : > { %s54_s28 = sadd.s32 1, %s4823_s26  ;;  %p52_p1 = scmp.eq.s32.totalorder %s51_s19, 0 }
  0xd3   : > { %p61_p3 = scmp.ne.s32.totalorder %s4823_s26, %s4819_s25  ;;  %p62_p11 = scmp.eq.s32.totalorder %s4827_s27, 0 }
  0xd4   : > { %p67_p12 = scmp.ne.s32.totalorder %s4819_s25, %s4815_s2  ;;  %p6065_p0 = scmp.eq.s32.totalorder %s4990_s29, 0 }
  0xd5   : > { %s5158_s16 = scalar_select %p52_p1, %s4823_s26, %s54_s28  }
  0xd6   : > { %p63_p13 = por %p62_p11, %p61_p3  ;;  %p5162_p2 = por %p6065_p0, %p67_p12 }
  0xd7   : > { %6064 = sst [smem:[#allocation45_spill]] %s5158_s16  ;;  %p521_p5 = scmp.eq.s32.totalorder %s4990_s29, 1 }
  0xd8   : > { %s6066_s30 = scalar_select %p5162_p2, 1, 0 }
  0xd9   : > { %p527_p7 = scmp.eq.s32.totalorder %s3289_s24, 1  ;;  %p4112_p9 = scmp.lt.s32.totalorder %s4827_s27, 2 }
  0xda   : > { %s6009_s11 = sand.u32 1, %s4823_s26   ;;  %p5169_p4 = por %p521_p5, %p61_p3 }
  0xdb   : > { %p5173_p10 = por %p527_p7, %p67_p12  ;;  %s5179_s22 = sshll.u32 %s6009_s11, 4 }
  0xdc   : > { %s6067_s0 = scalar_select %p5169_p4, 1, 0 }
  0xdd   : > { %s6069_s23 = scalar_select %p5173_p10, 1, 0 }
  0xde   : > { %6068 = sst [smem:[#allocation46_spill]] %s6067_s0  ;;  %s5182_s1 = sshll.u32 %s4827_s27, 8 }
  0xdf   : > { %6070 = sst [smem:[#allocation47_spill]] %s6069_s23  ;;  %p5184_p1 = pnand %p4112_p9, %p63_p13 }
  0xe0   : > { %s736_s20 = sand.u32 1, %s4827_s27   ;;  %s6072_s28 = sld [smem:[#allocation49_spill]] }
  0xe1   : > { %s6071_s21 = scalar_select %p5184_p1, 1, 0 }
  0xe2   : > { %s740_s11 = scalar_lea.vmem [#allocation7], %s5179_s22  ;;  %s4839_s7 = smov [#allocation12]  }
  0xe3   : > { %s747_s3 = sshll.u32 %s740_s11, 4  ;;  %s5198_s9 = sshll.u32 %s4839_s7, 4  ;;  %s5196_s3 = int_to_ptr.vmem [resolvable:$true] %s747_s3  ;;  %s560_s9 = int_to_ptr.vmem [resolvable:$true] %s5198_s9 }
  0xe4   : > { %s5200_s12 = scalar_lea.sflag [#allocation8], %s736_s20  ;;  %p5206_p11 = pneg %p5184_p1 }
  0xe6   : > { %s5193_s18 = scalar_lea.hbm %s6072_s28, %s5182_s1  ;;  %s4448_s17 = scalar_lea.hbm %s6072_s28, 512 }
  0xe7   : > { %s4443_s14 = scalar_lea.hbm %s5193_s18, 256  ;;  %p4449_p0 = scmp.lt.u32.totalorder %s5193_s18, %s6072_s28 }
  0xe8   : > { %p4444_p3 = scmp.ne.s32.totalorder %s5193_s18, %s4443_s14  ;;  %p4450_p5 = scmp.lt.u32.totalorder %s4448_s17, %s4443_s14 }
  0xe9   : > { %s6073_s24 = scalar_select %p5206_p11, 1, 0 }
  0xea   : > { %p4446_p12 = pnand %p5206_p11, %p4444_p3  ;;  %p4451_p7 = por %p4450_p5, %p4449_p0 }
  0xeb   : > { %p4452_p9 = scmp.lt.u32.totalorder %s4443_s14, %s5193_s18 }
  0xec   : > { %p4447_p13 = pneg %p4446_p12 }
  0xed   : > { %p4453_p10 = por %p4452_p9, %p4451_p7 }
  0xef   : > { %p4454_p4 = pnand %p4453_p10, %p4447_p13 }
  0xf1   : > { %4457 = shalt.err (!%p4454_p4)
}
  0xf2   : > { %s4458_s20 = scalar_lea.vmem %s5196_s3, 256  ;;  %s4840_s19 = smov [#allocation7]  }
  0xf3   : > { %p4459_p3 = scmp.ne.s32.totalorder %s5196_s3, %s4458_s20  ;;  %s4463_s11 = sshll.u32 %s4840_s19, 4  ;;  %s4464_s11 = int_to_ptr.vmem [resolvable:$false] %s4463_s11 }
  0xf4   : > { %s4465_s16 = scalar_lea.vmem %s4464_s11, 512  ;;  %p4466_p6 = scmp.lt.s32.totalorder %s5196_s3, %s4464_s11 }
  0xf5   : > { %p4461_p12 = pnand %p4459_p3, %p5206_p11  ;;  %p4467_p8 = scmp.lt.s32.totalorder %s4465_s16, %s4458_s20 }
  0xf7   : > { %p4462_p2 = pneg %p4461_p12  ;;  %p4468_p0 = por %p4467_p8, %p4466_p6 }
  0xf9   : > { %p4469_p5 = pnand %p4468_p0, %p4462_p2 }
  0xfb   : > { %4472 = shalt.err (!%p4469_p5)
}
  0xfc   : > { %s6074_s14 = smov 8   ;;  %s6075_s17 = smov 128  }
  0xfd   : > { %4091 = dma.hbm_to_vmem [thread:$0]  (!%p5184_p1), %s5193_s18, 256, %s5196_s3, %s5200_s12, %s6075_s17, %s6075_s17, %s6074_s14  }
  0xfe   : > { %s6076_s28 = sld [smem:[#allocation52_spill]]  ;;  %p6077_p8 = scmp.ne.s32.totalorder %s6057_s4, 0 }
 0x104   : > { %s4473_s11 = scalar_lea.hbm %s6076_s28, 1024 }
 0x105   : > { %p4474_p6 = scmp.ne.s32.totalorder %s6076_s28, %s4473_s11  ;;  %p4480_p10 = scmp.lt.u32.totalorder %s4473_s11, %s6076_s28 }
 0x107   : > { %p4476_p2 = pnand %p4474_p6, %p6077_p8 }
 0x109   : > { %p4477_p4 = pneg %p4476_p2 }
 0x10b   : > { %p4482_p13 = pnand %p4480_p10, %p4477_p4 }
 0x10d   : > { %4485 = shalt.err (!%p4482_p13)
}
 0x10e   : > { %s4486_s23 = scalar_lea.vmem %s560_s9, 1024  ;;  %p4494_p12 = scmp.lt.s32.totalorder %s560_s9, %s560_s9 }
 0x10f   : > { %p4487_p7 = scmp.ne.s32.totalorder %s560_s9, %s4486_s23  ;;  %p4495_p0 = scmp.lt.s32.totalorder %s4486_s23, %s4486_s23 }
 0x111   : > { %p4489_p9 = pnand %p4487_p7, %p6077_p8  ;;  %p4496_p5 = por %p4495_p0, %p4494_p12 }
 0x113   : > { %p4490_p3 = pneg %p4489_p9 }
 0x115   : > { %p4497_p1 = pnand %p4496_p5, %p4490_p3 }
 0x117   : > { %4500 = shalt.err (!%p4497_p1)
}
 0x118   : > { %p6078_p6 = scmp.ne.s32.totalorder %s6055_s5, 0  ;;  %s4841_s18 = smov [#allocation15]  }
 0x119   : > { %s585_s15 = sshll.u32 %s4841_s18, 4  ;;  %s4842_s7 = smov [#allocation18]   ;;  %s586_s15 = int_to_ptr.vmem [resolvable:$true] %s585_s15 }
 0x11a   : > { %4051 = dma.hbm_to_vmem [thread:$0]  (!%p6078_p6), %s6076_s28, 1024, %s560_s9, [#allocation11], %s6075_s17, %s6075_s17, %s6074_s14  }
 0x11b   : > { %s610_s19 = sshll.u32 %s4842_s7, 4  ;;  %s6079_s6 = sld [smem:[#allocation54_spill]]  ;;  %s611_s19 = int_to_ptr.vmem [resolvable:$true] %s610_s19 }
 0x121   : > { %s4501_s20 = scalar_lea.hbm %s6079_s6, 512 }
 0x122   : > { %p4502_p1 = scmp.ne.s32.totalorder %s6079_s6, %s4501_s20  ;;  %p4508_p10 = scmp.lt.u32.totalorder %s4501_s20, %s6079_s6 }
 0x124   : > { %p4504_p2 = pnand %p4502_p1, %p6077_p8 }
 0x126   : > { %p4505_p4 = pneg %p4504_p2 }
 0x128   : > { %p4510_p13 = pnand %p4508_p10, %p4505_p4 }
 0x12a   : > { %4513 = shalt.err (!%p4510_p13)
}
 0x12b   : > { %s4514_s9 = scalar_lea.vmem %s586_s15, 512  ;;  %p4522_p12 = scmp.lt.s32.totalorder %s586_s15, %s586_s15 }
 0x12c   : > { %p4515_p7 = scmp.ne.s32.totalorder %s586_s15, %s4514_s9  ;;  %p4523_p0 = scmp.lt.s32.totalorder %s4514_s9, %s4514_s9 }
 0x12e   : > { %p4517_p9 = pnand %p4515_p7, %p6077_p8  ;;  %p4524_p5 = por %p4523_p0, %p4522_p12 }
 0x130   : > { %p4518_p3 = pneg %p4517_p9 }
 0x132   : > { %p4525_p11 = pnand %p4524_p5, %p4518_p3 }
 0x134   : > { %4528 = shalt.err (!%p4525_p11)
}
 0x135   : > { %s6080_s2 = smov 4   ;;  %s6081_s3 = smov 64  }
 0x136   : > { %4057 = dma.hbm_to_vmem [thread:$0]  (!%p6078_p6), %s6079_s6, 512, %s586_s15, [#allocation14], %s6081_s3, %s6081_s3, %s6080_s2  }
 0x137   : > { %s6082_s8 = sld [smem:[#allocation56_spill]] }
 0x13d   : > { %s4529_s23 = scalar_lea.hbm %s6082_s8, 16 }
 0x13e   : > { %p4530_p1 = scmp.ne.s32.totalorder %s6082_s8, %s4529_s23  ;;  %p4536_p4 = scmp.lt.u32.totalorder %s4529_s23, %s6082_s8 }
 0x140   : > { %p4532_p11 = pnand %p4530_p1, %p6077_p8 }
 0x142   : > { %p4533_p2 = pneg %p4532_p11 }
 0x144   : > { %p4538_p10 = pnand %p4536_p4, %p4533_p2 }
 0x146   : > { %4541 = shalt.err (!%p4538_p10)
}
 0x147   : > { %s4542_s0 = scalar_lea.vmem %s611_s19, 16  ;;  %s4549_s15 = scalar_lea.vmem %s611_s19, 32 }
 0x148   : > { %p4543_p13 = scmp.ne.s32.totalorder %s611_s19, %s4542_s0  ;;  %p4550_p3 = scmp.lt.s32.totalorder %s611_s19, %s611_s19 }
 0x149   : > { %p4551_p12 = scmp.lt.s32.totalorder %s4549_s15, %s4542_s0 }
 0x14a   : > { %p4545_p7 = pnand %p4543_p13, %p6077_p8 }
 0x14b   : > { %p4552_p0 = por %p4551_p12, %p4550_p3 }
 0x14c   : > { %p4546_p9 = pneg %p4545_p7 }
 0x14e   : > { %p4553_p5 = pnand %p4552_p0, %p4546_p9 }
 0x150   : > { %4556 = shalt.err (!%p4553_p5)
}
 0x151   : > { %4063 = dma.hbm_to_vmem [thread:$0]  (!%p6078_p6), %s6082_s8, 16, %s611_s19, [#allocation17]  }
 0x152   : > { %s4843_s11 = smov [#allocation21]   ;;  %s4844_s20 = smov [#allocation24]  }
 0x153   : > { %s632_s23 = sshll.u32 %s4843_s11, 4  ;;  %s657_s16 = sshll.u32 %s4844_s20, 4  ;;  %s633_s23 = int_to_ptr.vmem [resolvable:$true] %s632_s23  ;;  %s658_s16 = int_to_ptr.vmem [resolvable:$true] %s657_s16 }
 0x154   : > { %s4557_s6 = scalar_lea.hbm %s5975_s10, 16 }
 0x155   : > { %p4558_p1 = scmp.ne.s32.totalorder %s5975_s10, %s4557_s6  ;;  %p4564_p4 = scmp.lt.u32.totalorder %s4557_s6, %s5975_s10 }
 0x157   : > { %p4560_p11 = pnand %p4558_p1, %p6077_p8 }
 0x159   : > { %p4561_p2 = pneg %p4560_p11 }
 0x15b   : > { %p4566_p10 = pnand %p4564_p4, %p4561_p2 }
 0x15d   : > { %4569 = shalt.err (!%p4566_p10)
}
 0x15e   : > { %s4570_s19 = scalar_lea.vmem %s633_s23, 16  ;;  %s4577_s7 = scalar_lea.vmem %s633_s23, 32 }
 0x15f   : > { %p4571_p13 = scmp.ne.s32.totalorder %s633_s23, %s4570_s19  ;;  %p4578_p3 = scmp.lt.s32.totalorder %s633_s23, %s633_s23 }
 0x160   : > { %p4579_p12 = scmp.lt.s32.totalorder %s4577_s7, %s4570_s19 }
 0x161   : > { %p4573_p7 = pnand %p4571_p13, %p6077_p8 }
 0x162   : > { %p4580_p0 = por %p4579_p12, %p4578_p3 }
 0x163   : > { %p4574_p9 = pneg %p4573_p7 }
 0x165   : > { %p4581_p5 = pnand %p4580_p0, %p4574_p9 }
 0x167   : > { %4584 = shalt.err (!%p4581_p5)
}
 0x168   : > { %4069 = dma.hbm_to_vmem [thread:$0]  (!%p6078_p6), %s5975_s10, 16, %s633_s23, [#allocation20]  }
 0x169   : > { %s4585_s27 = scalar_lea.hbm %s5978_s13, 16 }
 0x16a   : > { %p4586_p1 = scmp.ne.s32.totalorder %s5978_s13, %s4585_s27  ;;  %p4592_p4 = scmp.lt.u32.totalorder %s4585_s27, %s5978_s13 }
 0x16c   : > { %p4588_p11 = pnand %p4586_p1, %p6077_p8 }
 0x16e   : > { %p4589_p2 = pneg %p4588_p11 }
 0x170   : > { %p4594_p10 = pnand %p4592_p4, %p4589_p2 }
 0x172   : > { %4597 = shalt.err (!%p4594_p10)
}
 0x173   : > { %s4598_s19 = scalar_lea.vmem %s658_s16, 16  ;;  %s4605_s23 = scalar_lea.vmem %s658_s16, 32 }
 0x174   : > { %p4599_p13 = scmp.ne.s32.totalorder %s658_s16, %s4598_s19  ;;  %p4606_p3 = scmp.lt.s32.totalorder %s658_s16, %s658_s16 }
 0x175   : > { %p4607_p12 = scmp.lt.s32.totalorder %s4605_s23, %s4598_s19 }
 0x176   : > { %p4601_p7 = pnand %p4599_p13, %p6077_p8 }
 0x177   : > { %p4608_p0 = por %p4607_p12, %p4606_p3 }
 0x178   : > { %p4602_p9 = pneg %p4601_p7 }
 0x17a   : > { %p4609_p5 = pnand %p4608_p0, %p4602_p9 }
 0x17c   : > { %4612 = shalt.err (!%p4609_p5)
}
 0x17d   : > { %4075 = dma.hbm_to_vmem [thread:$0]  (!%p6078_p6), %s5978_s13, 16, %s658_s16, [#allocation23]  }
 0x17e   : > { %s4845_s20 = smov [#allocation27]   ;;  %s4846_s28 = smov [#allocation28]  }
 0x17f   : > { %s678_s6 = sshll.u32 %s4845_s20, 4  ;;  %s692_s27 = sshll.u32 %s4846_s28, 4  ;;  %s679_s6 = int_to_ptr.vmem [resolvable:$true] %s678_s6  ;;  %s693_s27 = int_to_ptr.vmem [resolvable:$true] %s692_s27 }
 0x180   : > { %s6083_s15 = sld [smem:[#allocation61_spill]] }
 0x186   : > { %s4613_s18 = scalar_lea.hbm %s6083_s15, 512 }
 0x187   : > { %p4614_p1 = scmp.ne.s32.totalorder %s6083_s15, %s4613_s18  ;;  %p4620_p4 = scmp.lt.u32.totalorder %s4613_s18, %s6083_s15 }
 0x189   : > { %p4616_p11 = pnand %p4614_p1, %p6077_p8 }
 0x18b   : > { %p4617_p2 = pneg %p4616_p11 }
 0x18d   : > { %p4622_p10 = pnand %p4620_p4, %p4617_p2 }
 0x18f   : > { %4625 = shalt.err (!%p4622_p10)
}
 0x190   : > { %s4626_s16 = scalar_lea.vmem %s679_s6, 512  ;;  %p4634_p3 = scmp.lt.s32.totalorder %s679_s6, %s679_s6 }
 0x191   : > { %p4627_p13 = scmp.ne.s32.totalorder %s679_s6, %s4626_s16  ;;  %p4635_p12 = scmp.lt.s32.totalorder %s4626_s16, %s4626_s16 }
 0x193   : > { %p4629_p7 = pnand %p4627_p13, %p6077_p8  ;;  %p4636_p0 = por %p4635_p12, %p4634_p3 }
 0x195   : > { %p4630_p9 = pneg %p4629_p7 }
 0x197   : > { %p4637_p5 = pnand %p4636_p0, %p4630_p9 }
 0x199   : > { %4640 = shalt.err (!%p4637_p5)
}
 0x19a   : > { %4081 = dma.hbm_to_vmem [thread:$0]  (!%p6078_p6), %s6083_s15, 512, %s679_s6, [#allocation26], %s6081_s3, %s6081_s3, %s6080_s2  }
 0x19b   : > { %s6084_s9 = sld [smem:[#allocation62_spill]] }
 0x1a1   : > { %s4641_s0 = scalar_lea.hbm %s6084_s9, 16 }
 0x1a2   : > { %p4642_p1 = scmp.ne.s32.totalorder %s6084_s9, %s4641_s0  ;;  %p4648_p4 = scmp.lt.u32.totalorder %s4641_s0, %s6084_s9 }
 0x1a4   : > { %p4644_p11 = pnand %p4642_p1, %p6077_p8 }
 0x1a6   : > { %p4645_p2 = pneg %p4644_p11 }
 0x1a8   : > { %p4650_p10 = pnand %p4648_p4, %p4645_p2 }
 0x1aa   : > { %4653 = shalt.err (!%p4650_p10)
}
 0x1ab   : > { %s4654_s16 = scalar_lea.vmem %s693_s27, 16  ;;  %s4661_s2 = scalar_lea.vmem %s693_s27, 32 }
 0x1ac   : > { %p4655_p13 = scmp.ne.s32.totalorder %s693_s27, %s4654_s16  ;;  %p4662_p3 = scmp.lt.s32.totalorder %s693_s27, %s693_s27 }
 0x1ad   : > { %p4663_p12 = scmp.lt.s32.totalorder %s4661_s2, %s4654_s16 }
 0x1ae   : > { %p4657_p7 = pnand %p4655_p13, %p6077_p8 }
 0x1af   : > { %p4664_p0 = por %p4663_p12, %p4662_p3 }
 0x1b0   : > { %p4658_p9 = pneg %p4657_p7 }
 0x1b2   : > { %p4665_p5 = pnand %p4664_p0, %p4658_p9 }
 0x1b4   : > { %4668 = shalt.err (!%p4665_p5)
}
 0x1b5   : > { %4084 = dma.hbm_to_vmem [thread:$0]  (!%p6078_p6), %s6084_s9, 16, %s693_s27, [#allocation29]  }
 0x1b6   : > { %s6085_s11 = sld [smem:[#allocation48_spill]]  ;;  %s719_s28 = scalar_lea.vmem [#allocation4], %s5179_s22 }
 0x1b7   : > { %s726_s5 = sshll.u32 %s719_s28, 4  ;;  %s6086_s19 = sld [smem:[#allocation50_spill]]  ;;  %s5376_s5 = int_to_ptr.vmem [resolvable:$true] %s726_s5 }
 0x1b8   : > { %s6087_s7 = sand.u32 1, %s4823_s26   ;;  %p6088_p6 = scmp.ne.s32.totalorder %s6073_s24, 0 }
 0x1b9   : > { %s5386_s27 = scalar_lea.sflag [#allocation5], %s6087_s7 }
 0x1bc   : > { %s5373_s20 = scalar_lea.hbm %s6085_s11, %s5182_s1  ;;  %s4674_s6 = scalar_lea.hbm %s6085_s11, 512 }
 0x1bd   : > { %s5382_s23 = scalar_lea.hbm %s6086_s19, %s5182_s1  ;;  %s4669_s16 = scalar_lea.hbm %s5373_s20, 256 }
 0x1be   : > { %p4670_p8 = scmp.ne.s32.totalorder %s5373_s20, %s4669_s16  ;;  %p4675_p2 = scmp.lt.u32.totalorder %s5373_s20, %s6085_s11 }
 0x1bf   : > { %p4676_p4 = scmp.lt.u32.totalorder %s4674_s6, %s4669_s16  ;;  %p4678_p13 = scmp.lt.u32.totalorder %s4669_s16, %s5373_s20 }
 0x1c0   : > { %p4672_p1 = pnand %p4670_p8, %p6088_p6 }
 0x1c1   : > { %p4677_p10 = por %p4676_p4, %p4675_p2 }
 0x1c2   : > { %p4673_p11 = pneg %p4672_p1 }
 0x1c3   : > { %p4679_p7 = por %p4678_p13, %p4677_p10 }
 0x1c5   : > { %p4680_p9 = pnand %p4679_p7, %p4673_p11 }
 0x1c7   : > { %4683 = shalt.err (!%p4680_p9)
}
 0x1c8   : > { %s4684_s1 = scalar_lea.vmem %s5376_s5, 256  ;;  %s4847_s28 = smov [#allocation4]  }
 0x1c9   : > { %p4685_p3 = scmp.ne.s32.totalorder %s5376_s5, %s4684_s1  ;;  %s4689_s0 = sshll.u32 %s4847_s28, 4  ;;  %s4690_s0 = int_to_ptr.vmem [resolvable:$false] %s4689_s0 }
 0x1ca   : > { %s4691_s18 = scalar_lea.vmem %s4690_s0, 512  ;;  %p4692_p5 = scmp.lt.s32.totalorder %s5376_s5, %s4690_s0 }
 0x1cb   : > { %p4687_p12 = pnand %p4685_p3, %p6088_p6  ;;  %p4693_p8 = scmp.lt.s32.totalorder %s4691_s18, %s4684_s1 }
 0x1cd   : > { %p4688_p0 = pneg %p4687_p12  ;;  %p4694_p1 = por %p4693_p8, %p4692_p5 }
 0x1cf   : > { %p4695_p2 = pnand %p4694_p1, %p4688_p0 }
 0x1d1   : > { %4698 = shalt.err (!%p4695_p2)
}
 0x1d2   : > { %p6089_p11 = scmp.ne.s32.totalorder %s6071_s21, 0  ;;  %s761_s7 = scalar_lea.vmem [#allocation9], %s5179_s22 }
 0x1d3   : > { %s768_s16 = sshll.u32 %s761_s7, 4  ;;  %s4699_s2 = scalar_lea.hbm %s5382_s23, 256  ;;  %s5414_s16 = int_to_ptr.vmem [resolvable:$true] %s768_s16 }
 0x1d4   : > { %4088 = dma.hbm_to_vmem [thread:$0]  (!%p6089_p11), %s5373_s20, 256, %s5376_s5, %s5386_s27, %s6075_s17, %s6075_s17, %s6074_s14  }
 0x1d5   : > { %p4700_p4 = scmp.ne.s32.totalorder %s5382_s23, %s4699_s2  ;;  %s4704_s4 = scalar_lea.hbm %s6086_s19, 512 }
 0x1d6   : > { %p4705_p7 = scmp.lt.u32.totalorder %s5382_s23, %s6086_s19  ;;  %p4706_p9 = scmp.lt.u32.totalorder %s4704_s4, %s4699_s2 }
 0x1d7   : > { %p4702_p10 = pnand %p4700_p4, %p6088_p6  ;;  %p4708_p12 = scmp.lt.u32.totalorder %s4699_s2, %s5382_s23 }
 0x1d8   : > { %p4707_p3 = por %p4706_p9, %p4705_p7 }
 0x1d9   : > { %p4703_p13 = pneg %p4702_p10 }
 0x1da   : > { %p4709_p0 = por %p4708_p12, %p4707_p3 }
 0x1dc   : > { %p4710_p5 = pnand %p4709_p0, %p4703_p13 }
 0x1de   : > { %4713 = shalt.err (!%p4710_p5)
}
 0x1df   : > { %s4714_s22 = scalar_lea.vmem %s5414_s16, 256  ;;  %s4848_s20 = smov [#allocation9]  }
 0x1e0   : > { %p4715_p8 = scmp.ne.s32.totalorder %s5414_s16, %s4714_s22  ;;  %s4719_s5 = sshll.u32 %s4848_s20, 4  ;;  %s4720_s5 = int_to_ptr.vmem [resolvable:$false] %s4719_s5 }
 0x1e1   : > { %s4721_s27 = scalar_lea.vmem %s4720_s5, 512  ;;  %p4722_p4 = scmp.lt.s32.totalorder %s5414_s16, %s4720_s5 }
 0x1e2   : > { %p4717_p1 = pnand %p4715_p8, %p6088_p6  ;;  %p4723_p10 = scmp.lt.s32.totalorder %s4721_s27, %s4714_s22 }
 0x1e4   : > { %p4718_p2 = pneg %p4717_p1  ;;  %p4724_p7 = por %p4723_p10, %p4722_p4 }
 0x1e6   : > { %p4725_p9 = pnand %p4724_p7, %p4718_p2 }
 0x1e8   : > { %4728 = shalt.err (!%p4725_p9)
}
 0x1e9   : > { %4094 = dma.hbm_to_vmem [thread:$0]  (!%p6089_p11), %s5382_s23, 256, %s5414_s16, %s5200_s12, %s6075_s17, %s6075_s17, %s6074_s14  }
 0x1ea   : > { %s6090_s24 = sld [smem:[#allocation43_spill]] }
 0x1f0   : > { %p6091_p6 = scmp.ne.s32.totalorder %s6090_s24, 0 }
 0x1f1   : > { %s5444_s28 = sand.u32 (!%p6091_p6), 1, %s4819_s25   ;;  %p6092_p13 = scmp.ne.s32.totalorder (!%p6091_p6), %s6066_s30, 0 }
 0x1f2   : > { %780 = sbr.rel (%p6091_p6) target bundleno = 4562 (0x11d2), region = 104  ;;  %s5447_s0 = sshll.u32 (!%p6091_p6), %s5444_s28, 4 }
 0x1f3   : > { %s783_s21 = scalar_lea.sflag (!%p6091_p6), [#allocation5], %s5444_s28  ;;  %s5451_s18 = scalar_lea.vmem (!%p6091_p6), [#allocation4], %s5447_s0 }
 0x1f9   : > { %4774 = dma.done.wait (%p6092_p13), %s783_s21, 256  }
 0x1fa   : > { %4776 = vsyncadd (%p6092_p13), %s783_s21, 4294967040  ;;  %s791_s12 = sand.u32 1, %s4990_s29   ;;  %s795_s17 = scalar_lea.vmem [#allocation7], %s5447_s0 }
 0x1fb   : > { %s792_s14 = scalar_lea.sflag [#allocation8], %s791_s12 }
 0x1fc   : > { %4778 = dma.done.wait (%p6092_p13), %s792_s14, 512  }
 0x1fd   : > { %4780 = vsyncadd (%p6092_p13), %s792_s14, 4294966784  ;;  %s804_s23 = scalar_lea.vmem [#allocation9], %s5447_s0  ;;  %p6093_p11 = scmp.eq.s32.totalorder %s4990_s29, 0 }
 0x1ff   : > { %4782 = dma.done.wait (%p6093_p11), [#allocation11], 2048   ;;  %p6094_p3 = pmov %p6093_p11 }
 0x201   : > { %4784 = vsyncadd (%p6094_p3), [#allocation11], 4294965248  ;;  %p6095_p12 = pmov %p6094_p3 }
 0x202   : > { %p6096_p0 = pmov %p6094_p3 }
 0x203   : > { %4786 = dma.done.wait (%p6095_p12), [#allocation14], 1024  }
 0x204   : > { %4788 = vsyncadd (%p6096_p0), [#allocation14], 4294966272  ;;  %p6097_p5 = pmov %p6096_p0 }
 0x205   : > { %p6098_p8 = pmov %p6096_p0 }
 0x206   : > { %4790 = dma.done.wait (%p6097_p5), [#allocation17], 32  }
 0x207   : > { %4792 = vsyncadd (%p6098_p8), [#allocation17], 4294967264  ;;  %p6099_p1 = pmov %p6096_p0 }
 0x208   : > { %p6100_p2 = pmov %p6096_p0 }
 0x209   : > { %4794 = dma.done.wait (%p6099_p1), [#allocation20], 32  }
 0x20a   : > { %4796 = vsyncadd (%p6100_p2), [#allocation20], 4294967264  ;;  %p6101_p4 = pmov %p6096_p0 }
 0x20b   : > { %p6102_p10 = pmov %p6096_p0 }
 0x20c   : > { %4798 = dma.done.wait (%p6101_p4), [#allocation23], 32  }
 0x20d   : > { %4800 = vsyncadd (%p6102_p10), [#allocation23], 4294967264  ;;  %p6103_p7 = pmov %p6096_p0 }
 0x20e   : > { %p6104_p9 = pmov %p6096_p0 }
 0x20f   : > { %4802 = dma.done.wait (%p6103_p7), [#allocation26], 528  }
 0x210   : > { %4804 = vsyncadd (%p6104_p9), [#allocation26], 4294966768  ;;  %p6105_p6 = pmov %p6096_p0 }
 0x211   : > { %p6106_p13 = pmov %p6096_p0 }
 0x212   : > { %4806 = dma.done.wait (%p6105_p6), [#allocation29], 16  }
 0x213   : > { %4808 = vsyncadd (%p6106_p13), [#allocation29], 4294967280  ;;  %v4849_v0 = vmov 0   ;;  %v4850_v1 = vmov 0.0   ;;  %vm4851_vm0 = vmmov 0   ;;  %v4197_v8 = vld [vmem:[#allocation13] sm:$0xff]  }
 0x214   : > { %1025 = vmatprep.mubr.bf16.mxu0 %v4849_v0  ;;  %3553 = vmatprep.subr.bf16.mxu1 %v4850_v1  ;;  %v4185_v2 = vld [vmem:[#allocation12 + $0x4] ss:$8 sps:$4 sm:$0xff]   ;;  %v4187_v3 = vld [vmem:[#allocation12] ss:$8 sps:$4 sm:$0xff]   ;;  %v4188_v4 = vld [vmem:[#allocation12 + $0x14] ss:$8 sps:$4 sm:$0xff]  }
 0x215   : > { %3561 = vmatprep.mubr.msk.bf16.mxu1 %vm4851_vm0, %v4850_v1  ;;  %993 = vmatprep.subr.bf16.mxu0 %v4185_v2  ;;  %v4190_v5 = vld [vmem:[#allocation12 + $0x10] ss:$8 sps:$4 sm:$0xff]   ;;  %v4191_v6 = vld [vmem:[#allocation12 + $0x24] ss:$8 sps:$4 sm:$0xff]   ;;  %v4193_v7 = vld [vmem:[#allocation12 + $0x20] ss:$8 sps:$4 sm:$0xff]  }
 0x216   : > { %994 = vmatpush1.bf16.msra.mxu0 %v4187_v3  ;;  %v4194_v9 = vld [vmem:[#allocation12 + $0x34] ss:$8 sps:$4 sm:$0xff]   ;;  %3554 = vmatpush3.bf16.msra.mxu1 %v4197_v8  ;;  %v4198_v10 = vld [vmem:[#allocation13 + $0x8] sm:$0xff]   ;;  %v4196_v11 = vld [vmem:[#allocation12 + $0x30] ss:$8 sps:$4 sm:$0xff]   ;;  %vm989_vm1 = vcmask 523264  }
 0x217   : > { %995 = vmatprep.subr.bf16.mxu0 %v4188_v4  ;;  %3555 = vmatprep.subr.bf16.mxu1 %v4850_v1  ;;  %v926_v12 = vld [vmem:[%s5451_s18] sm:$0xff]  ;;  %v927_v13 = vld [vmem:[%s5451_s18 + $0x8] sm:$0xff]  ;;  %s4852_s30 = smov 64   ;;  %s4853_s7 = smov 112   ;;  %vm1975_vm2 = vcmask 130048   ;;  %vm2029_vm3 = vcmask 392192  }
 0x218   : > { %v4199_v14 = vld [vmem:[#allocation13 + $0x10] sm:$0xff]   ;;  %v932_v15 = vld [vmem:[#allocation10] sm:$0xff]  ;;  %v933_v16 = vld [vmem:[#allocation10 + $0x8] sm:$0xff]  ;;  %v940_v17 = vpack.c.bf16 %v927_v13, %v926_v12  ;;  %s4854_s16 = smov 96   ;;  %s4855_s2 = smov 80  }
 0x219   : > { %v4200_v18 = vld [vmem:[#allocation13 + $0x18] sm:$0xff]   ;;  %v928_v19 = vld [vmem:[%s795_s17] sm:$0xff]  ;;  %v5505_v23 = vpack.c.bf16 %v933_v16, %v932_v15  ;;  %v937_v26 = vld [vmem:[#allocation10 + $0x28] sm:$0xff]  ;;  %s6107_s4 = sld [smem:[#allocation58_spill]]  ;;  %s6109_s3 = sld [smem:[#allocation64_spill]] }
 0x21a   : > { %996 = vmatpush1.bf16.msra.mxu0 %v4190_v5  ;;  %3556 = vmatpush3.bf16.msra.mxu1 %v4198_v10  ;;  %v929_v20 = vld [vmem:[%s795_s17 + $0x8] sm:$0xff]  ;;  %v934_v21 = vld [vmem:[#allocation10 + $0x10] sm:$0xff]  ;;  %v936_v25 = vld [vmem:[#allocation10 + $0x20] sm:$0xff]  ;;  %s6110_s1 = sld [smem:[#allocation65_spill]]  ;;  %s6111_s5 = sld [smem:[#allocation66_spill]] }
 0x21b   : > { %997 = vmatprep.subr.bf16.mxu0 %v4191_v6  ;;  %3557 = vmatprep.subr.bf16.mxu1 %v4850_v1  ;;  %v935_v22 = vld [vmem:[#allocation10 + $0x18] sm:$0xff]  ;;  %v1036_v24 = vpack.c.bf16 %v929_v20, %v928_v19  ;;  %v5516_v28 = vpack.c.bf16 %v937_v26, %v936_v25  ;;  %v938_v29 = vld [vmem:[#allocation10 + $0x30] sm:$0xff]  ;;  %v4201_v41 = vld [vmem:[#allocation15] sm:$0xff]   ;;  %s6112_s27 = sld [smem:[#allocation46_spill]]  ;;  %s3412_s24 = sshll.u32 %s4990_s29, 8 }
 0x21c   : > { %v5511_v27 = vpack.c.bf16 %v935_v22, %v934_v21  ;;  %v939_v30 = vld [vmem:[#allocation10 + $0x38] sm:$0xff]  ;;  %v4202_v43 = vld [vmem:[#allocation15 + $0x8] sm:$0xff]   ;;  %v4203_v44 = vld [vmem:[#allocation15 + $0x10] sm:$0xff]   ;;  %s924_s21 = scalar_lea.vmem [#allocation30], %s5447_s0  ;;  %s3036_s29 = scalar_lea.sflag [#allocation6], %s5444_s28 }
 0x21d   : > { %v5520_v31 = vpack.c.bf16 %v939_v30, %v938_v29  ;;  %v4204_v45 = vld [vmem:[#allocation15 + $0x18] sm:$0xff]   ;;  %v930_v46 = vld [vmem:[%s804_s23] sm:$0xff]  ;;  %s3049_s12 = sshll.u32 %s924_s21, 4  ;;  %s5919_s12 = int_to_ptr.vmem [resolvable:$true] %s3049_s12 }
 0x21e   : > { %998 = vmatpush1.bf16.msra.mxu0 %v4193_v7  ;;  %3558 = vmatpush3.bf16.msra.mxu1 %v4199_v14  ;;  %v931_v47 = vld [vmem:[%s804_s23 + $0x8] sm:$0xff]  ;;  %v3355_v10 = vld [vmem:[#allocation16] ss:$0 sm:$0xff]  ;;  %v3356_v15 = vld [vmem:[#allocation18] ss:$0 sm:$0xff]  ;;  %s6113_s23 = sld [smem:[#allocation67_spill]] }
 0x21f   : > { %999 = vmatprep.subr.bf16.mxu0 %v4194_v9  ;;  %3559 = vmatprep.subr.bf16.mxu1 %v4850_v1  ;;  %v1113_v48 = vpack.c.bf16 %v931_v47, %v930_v46  ;;  %s4729_s0 = scalar_lea.vmem %s5919_s12, 256 }
 0x220   : > { %p4730_p11 = scmp.ne.s32.totalorder %s5919_s12, %s4729_s0 }
 0x221   : > { %p6114_p3 = scmp.ne.s32.totalorder %s6112_s27, 0 }
 0x222   : > { %1000 = vmatpush1.bf16.msra.mxu0 %v4196_v11  ;;  %3560 = vmatpush3.bf16.msra.mxu1 %v4200_v18 }
 0x223   : > { %3565 = vmatprep.subr.bf16.mxu0 %v4850_v1  ;;  %3858 = vmatprep.subr.bf16.mxu1 %v5505_v23  ;;  %p4731_p12 = pnand %p4730_p11, %p6114_p3 }
 0x225   : > { %3340 = vmatmul.mubr.msk.bf16.vlgmr.msra.gmra.mrb[0].mxu0 %vm989_vm1, %v940_v17  ;;  %3562 = vmatmul.mubr.msk.bf16.vlgmr.msra.gmra.mrb[0].mxu1 %vm989_vm1, %v1036_v24  ;;  %p4732_p0 = pneg %p4731_p12 }
 0x226   : > { %3573 = vmatprep.mubr.msk.bf16.mxu0 %vm4851_vm0, %v4850_v1  ;;  %3860 = vmatpush3.bf16.msra.mxu1 %v5505_v23 }
 0x227   : > { %3862 = vmatprep.subr.bf16.mxu1 %v5511_v27  ;;  %3566 = vmatpush3.bf16.msra.mxu0 %v4201_v41 }
 0x228   : > { %3567 = vmatprep.subr.bf16.mxu0 %v4850_v1 }
 0x22a   : > { %3864 = vmatpush3.bf16.msra.mxu1 %v5511_v27 }
 0x22b   : > { %3866 = vmatprep.subr.bf16.mxu1 %v5516_v28  ;;  %3568 = vmatpush3.bf16.msra.mxu0 %v4202_v43 }
 0x22c   : > { %3569 = vmatprep.subr.bf16.mxu0 %v4850_v1 }
 0x22e   : > { %3868 = vmatpush3.bf16.msra.mxu1 %v5516_v28 }
 0x22f   : > { %3870 = vmatprep.subr.bf16.mxu1 %v5520_v31  ;;  %3570 = vmatpush3.bf16.msra.mxu0 %v4203_v44 }
 0x230   : > { %3571 = vmatprep.subr.bf16.mxu0 %v4850_v1 }
 0x232   : > { %3872 = vmatpush3.bf16.msra.mxu1 %v5520_v31 }
 0x233   : > { %3890 = vmatprep.subr.bf16.mxu1 %v5505_v23  ;;  %3572 = vmatpush3.bf16.msra.mxu0 %v4204_v45 }
 0x234   : > { %3874 = vmatprep.subr.bf16.mxu0 %v5505_v23 }
 0x236   : > { %3574 = vmatmul.mubr.msk.bf16.vlgmr.msra.gmra.mrb[4].mxu0 %vm989_vm1, %v1113_v48  ;;  %v3362_v48 = vld [vmem:[#allocation21] ss:$0 sm:$0xff] }
 0x237   : > { %3876 = vmatpush3.bf16.msra.mxu0 %v5505_v23 }
 0x238   : > { %3878 = vmatprep.subr.bf16.mxu0 %v5511_v27 }
 0x23b   : > { %3880 = vmatpush3.bf16.msra.mxu0 %v5511_v27 }
 0x23c   : > { %3882 = vmatprep.subr.bf16.mxu0 %v5516_v28 }
 0x23f   : > { %3884 = vmatpush3.bf16.msra.mxu0 %v5516_v28 }
 0x240   : > { %3886 = vmatprep.subr.bf16.mxu0 %v5520_v31 }
 0x243   : > { %3888 = vmatpush3.bf16.msra.mxu0 %v5520_v31 }
 0x244   : > { %3906 = vmatprep.subr.bf16.mxu0 %v5505_v23 }
 0x2f8   : > { %v5526_v32 = vpop.f32.mrb[0].mxu0  ;;  %v5540_v37 = vpop.f32.mrb[0].mxu1 }
 0x2f9   : > { %1382 = vrot.lane.b32.xlu0 %v5526_v32, %s4852_s30  ;;  %v1029_v33 = vpop.f32.mrb[1].mxu0  ;;  %3593 = vmatprep.mubr.msk.f32.mxu1 %vm989_vm1, %v5526_v32  ;;  %v3563_v38 = vpop.f32.mrb[1].mxu1 }
 0x2fa   : > { %v5532_v34 = vpop.f32.mrb[2].mxu0  ;;  %v5543_v39 = vpop.f32.mrb[2].mxu1 }
 0x2fb   : > { %v1033_v35 = vpop.f32.mrb[3].mxu0  ;;  %3594 = vmatmul.mubr.msk.f32.vlgmr.msra.gmra.mrb[4].mxu1 %vm989_vm1, %v5532_v34  ;;  %v1956_v40 = vpack.c.bf16 %v5543_v39, %v5540_v37  ;;  %v3564_v42 = vpop.f32.mrb[3].mxu1 }
 0x2fc   : > { %v1954_v36 = vpack.c.bf16 %v1033_v35, %v1029_v33  ;;  %3892 = vmatpush3.bf16.msra.mxu1 %v5505_v23 }
 0x2fd   : > { %1384 = vrot.lane.b32.xlu0 %v5532_v34, %s4852_s30  ;;  %3894 = vmatprep.subr.bf16.mxu1 %v5511_v27 }
 0x2fe   : > { %1955 = vst.msk [vmem:[#allocation3] sm:$0xff] %vm989_vm1, %v1954_v36 }
 0x300   : > { %3896 = vmatpush3.bf16.msra.mxu1 %v5511_v27 }
 0x301   : > { %3898 = vmatprep.subr.bf16.mxu1 %v5516_v28 }
 0x304   : > { %3900 = vmatpush3.bf16.msra.mxu1 %v5516_v28 }
 0x305   : > { %3902 = vmatprep.subr.bf16.mxu1 %v5520_v31 }
 0x308   : > { %3904 = vmatpush3.bf16.msra.mxu1 %v5520_v31 }
 0x309   : > { %3922 = vmatprep.subr.bf16.mxu1 %v5505_v23  ;;  %v5604_v57 = vpop.f32.mrb[4].mxu0 }
 0x30a   : > { %v3575_v58 = vpop.f32.mrb[5].mxu0 }
 0x30b   : > { %v5608_v59 = vpop.f32.mrb[6].mxu0 }
 0x30c   : > { %v1962_v60 = vpack.c.bf16 %v5608_v59, %v5604_v57  ;;  %v3576_v61 = vpop.f32.mrb[7].mxu0 }
 0x36b   : > { %v1383_v49 = vpop.permute.xlu0 %1382 }
 0x36c   : > { %3631 = vmatprep.mubr.msk.f32.mxu1 %vm989_vm1, %v1383_v49 }
 0x36f   : > { %v1385_v50 = vpop.permute.xlu0 %1384 }
 0x370   : > { %3632 = vmatmul.mubr.msk.f32.vlgmr.msra.gmra.mrb[6].mxu1 %vm989_vm1, %v1385_v50  ;;  %v3361_v50 = vld [vmem:[#allocation19] ss:$0 sm:$0xff] }
 0x371   : > { %3924 = vmatpush3.bf16.msra.mxu1 %v5505_v23  ;;  %3669 = vmatprep.mubr.msk.f32.mxu1 %vm989_vm1, %v5540_v37 }
 0x372   : > { %3926 = vmatprep.subr.bf16.mxu1 %v5511_v27 }
 0x375   : > { %3928 = vmatpush3.bf16.msra.mxu1 %v5511_v27 }
 0x376   : > { %3930 = vmatprep.subr.bf16.mxu1 %v5516_v28 }
 0x379   : > { %3932 = vmatpush3.bf16.msra.mxu1 %v5516_v28 }
 0x37a   : > { %3934 = vmatprep.subr.bf16.mxu1 %v5520_v31 }
 0x37d   : > { %3936 = vmatpush3.bf16.msra.mxu1 %v5520_v31 }
 0x37e   : > { %3954 = vmatprep.subr.bf16.mxu1 %v5505_v23 }
 0x380   : > { %3670 = vmatmul.mubr.msk.f32.vlgmr.msra.gmra.mrb[8].mxu1 %vm989_vm1, %v5543_v39 }
 0x381   : > { %3956 = vmatpush3.bf16.msra.mxu1 %v5505_v23  ;;  %3707 = vmatprep.mubr.msk.f32.mxu1 %vm989_vm1, %v5604_v57 }
 0x382   : > { %3958 = vmatprep.subr.bf16.mxu1 %v5511_v27 }
 0x385   : > { %3960 = vmatpush3.bf16.msra.mxu1 %v5511_v27 }
 0x386   : > { %3962 = vmatprep.subr.bf16.mxu1 %v5516_v28 }
 0x389   : > { %3964 = vmatpush3.bf16.msra.mxu1 %v5516_v28 }
 0x38a   : > { %3966 = vmatprep.subr.bf16.mxu1 %v5520_v31 }
 0x38d   : > { %3968 = vmatpush3.bf16.msra.mxu1 %v5520_v31 }
 0x38e   : > { %3729 = vmatprep.subr.bf16.mxu1 %v4850_v1 }
 0x390   : > { %3708 = vmatmul.mubr.msk.f32.vlgmr.msra.gmra.mrb[10].mxu1 %vm989_vm1, %v5608_v59 }
 0x391   : > { %3735 = vmatprep.mubr.msk.bf16.mxu1 %vm4851_vm0, %v4850_v1 }
 0x3ce   : > { %v3595_v51 = vpop.f32.mrb[4].mxu1 }
 0x3cf   : > { %v1276_v52 = vsub.f32 %v5532_v34, %v3595_v51  ;;  %v1266_v53 = vpop.f32.mrb[5].mxu1 }
 0x3d0   : > { %v1275_v54 = vsub.f32 %v5526_v32, %v1266_v53 }
 0x3d1   : > { %v1278_v56 = vmul.f32 %v1276_v52, %v1276_v52 }
 0x3d2   : > { %v1277_v55 = vmul.f32 %v1275_v54, %v1275_v54 }
 0x3d4   : > { %3612 = vmatprep.mubr.msk.f32.mxu0 %vm989_vm1, %v1277_v55 }
 0x3d5   : > { %3613 = vmatmul.mubr.msk.f32.vlgmr.msra.gmra.mrb[8].mxu0 %vm989_vm1, %v1278_v56 }
 0x3d6   : > { %3908 = vmatpush3.bf16.msra.mxu0 %v5505_v23 }
 0x3d7   : > { %3910 = vmatprep.subr.bf16.mxu0 %v5511_v27 }
 0x3da   : > { %3912 = vmatpush3.bf16.msra.mxu0 %v5511_v27 }
 0x3db   : > { %3914 = vmatprep.subr.bf16.mxu0 %v5516_v28 }
 0x3de   : > { %3916 = vmatpush3.bf16.msra.mxu0 %v5516_v28 }
 0x3df   : > { %3918 = vmatprep.subr.bf16.mxu0 %v5520_v31 }
 0x3e2   : > { %3920 = vmatpush3.bf16.msra.mxu0 %v5520_v31 }
 0x3e3   : > { %3938 = vmatprep.subr.bf16.mxu0 %v5505_v23 }
 0x443   : > { %v3633_v62 = vpop.f32.mrb[6].mxu1 }
 0x444   : > { %v1456_v63 = vpop.f32.mrb[7].mxu1 }
 0x445   : > { %1467 = vrot.lane.b32.xlu1 %v1456_v63, %s4852_s30 }
 0x449   : > { %1469 = vrot.lane.b32.xlu1 %v3633_v62, %s4852_s30 }
 0x453   : > { %v3671_v0 = vpop.f32.mrb[8].mxu1 }
 0x454   : > { %v5619_v2 = vsub.f32 %v5543_v39, %v3671_v0  ;;  %v1674_v3 = vpop.f32.mrb[9].mxu1 }
 0x455   : > { %v5622_v4 = vsub.f32 %v5540_v37, %v1674_v3 }
 0x456   : > { %v1686_v43 = vmul.f32 %v5619_v2, %v5619_v2 }
 0x457   : > { %v1685_v38 = vmul.f32 %v5622_v4, %v5622_v4 }
 0x4a8   : > { %v3614_v5 = vpop.f32.mrb[8].mxu0 }
 0x4a9   : > { %v1357_v6 = vadd.f32 1e-05, %v3614_v5  ;;  %v1351_v7 = vpop.f32.mrb[9].mxu0 }
 0x4aa   : > { %v1352_v8 = vadd.f32 1e-05, %v1351_v7 }
 0x4ab   : > { %4217 = vrsqrt.f32 %v1357_v6 }
 0x4ac   : > { %4219 = vrsqrt.f32 %v1352_v8 }
 0x4b5   : > { %v4218_v9 = vpop.eup %4217 }
 0x4b6   : > { %v4220_v11 = vpop.eup %4219  ;;  %v1363_v12 = vmul.f32 %v4218_v9, %v1276_v52 }
 0x4b7   : > { %v1362_v13 = vmul.f32 %v4220_v11, %v1275_v54  ;;  %v1468_v14 = vpop.permute.xlu1 %1467 }
 0x4b8   : > { %v5625_v16 = vsub.f32 %v5526_v32, %v1468_v14  ;;  %v1371_v17 = vmul.f32 %v3355_v10, %v1363_v12  ;;  %v3709_v32 = vpop.f32.mrb[10].mxu1 }
 0x4b9   : > { %v1370_v18 = vmul.f32 %v3355_v10, %v1362_v13  ;;  %v5639_v33 = vsub.f32 %v5608_v59, %v3709_v32  ;;  %v1850_v35 = vpop.f32.mrb[11].mxu1 }
 0x4ba   : > { %v1475_v19 = vmul.f32 %v5625_v16, %v5625_v16  ;;  %v1379_v20 = vadd.f32 %v3356_v15, %v1371_v17  ;;  %v5642_v36 = vsub.f32 %v5604_v57, %v1850_v35 }
 0x4bb   : > { %v1470_v21 = vpop.permute.xlu1 %1469  ;;  %v1378_v22 = vadd.f32 %v3356_v15, %v1370_v18  ;;  %v1862_v44 = vmul.f32 %v5639_v33, %v5639_v33 }
 0x4bc   : > { %v5630_v24 = vsub.f32 %v5532_v34, %v1470_v21  ;;  %1479 = vrot.lane.b32.xlu0 %v1475_v19, %s4852_s30  ;;  %v1381_v25 = vmul.f32 0.125, %v1379_v20  ;;  %v1861_v42 = vmul.f32 %v5642_v36, %v5642_v36 }
 0x4bd   : > { %v1380_v26 = vmul.f32 0.125, %v1378_v22 }
 0x4be   : > { %v1476_v29 = vmul.f32 %v5630_v24, %v5630_v24 }
 0x4bf   : > { %v5635_v30 = vpack.c.bf16 %v1381_v25, %v1380_v26 }
 0x4c0   : > { %1481 = vrot.lane.b32.xlu1 %v1476_v29, %s4852_s30 }
 0x52e   : > { %v1480_v34 = vpop.permute.xlu0 %1479 }
 0x52f   : > { %3650 = vmatprep.mubr.msk.f32.mxu0 %vm989_vm1, %v1480_v34 }
 0x532   : > { %v1482_v41 = vpop.permute.xlu1 %1481 }
 0x533   : > { %3651 = vmatmul.mubr.msk.f32.vlgmr.msra.gmra.mrb[10].mxu0 %vm989_vm1, %v1482_v41 }
 0x534   : > { %3940 = vmatpush3.bf16.msra.mxu0 %v5505_v23  ;;  %3688 = vmatprep.mubr.msk.f32.mxu0 %vm989_vm1, %v1685_v38 }
 0x535   : > { %3942 = vmatprep.subr.bf16.mxu0 %v5511_v27 }
 0x538   : > { %3944 = vmatpush3.bf16.msra.mxu0 %v5511_v27 }
 0x539   : > { %3946 = vmatprep.subr.bf16.mxu0 %v5516_v28 }
 0x53c   : > { %3948 = vmatpush3.bf16.msra.mxu0 %v5516_v28 }
 0x53d   : > { %3950 = vmatprep.subr.bf16.mxu0 %v5520_v31 }
 0x540   : > { %3952 = vmatpush3.bf16.msra.mxu0 %v5520_v31 }
 0x541   : > { %3970 = vmatprep.subr.bf16.mxu0 %v5505_v23 }
 0x543   : > { %3689 = vmatmul.mubr.msk.f32.vlgmr.msra.gmra.mrb[12].mxu0 %vm989_vm1, %v1686_v43 }
 0x544   : > { %3972 = vmatpush3.bf16.msra.mxu0 %v5505_v23  ;;  %3726 = vmatprep.mubr.msk.f32.mxu0 %vm989_vm1, %v1861_v42  ;;  %v5674_v23 = vld [vmem:[#allocation3] sm:$0xff] }
 0x545   : > { %3974 = vmatprep.subr.bf16.mxu0 %v5511_v27 }
 0x548   : > { %3976 = vmatpush3.bf16.msra.mxu0 %v5511_v27 }
 0x549   : > { %3978 = vmatprep.subr.bf16.mxu0 %v5516_v28 }
 0x54c   : > { %3980 = vmatpush3.bf16.msra.mxu0 %v5516_v28 }
 0x54d   : > { %3982 = vmatprep.subr.bf16.mxu0 %v5520_v31 }
 0x550   : > { %3984 = vmatpush3.bf16.msra.mxu0 %v5520_v31 }
 0x551   : > { %3739 = vmatprep.subr.bf16.mxu0 %v4850_v1 }
 0x553   : > { %3727 = vmatmul.mubr.msk.f32.vlgmr.msra.gmra.mrb[14].mxu0 %vm989_vm1, %v1862_v44 }
 0x554   : > { %3740 = vmatpush3.bf16.msra.mxu0 %v5674_v23  ;;  %3745 = vmatprep.mubr.msk.bf16.mxu0 %vm4851_vm0, %v4850_v1 }
 0x555   : > { %3741 = vmatprep.subr.bf16.mxu0 %v4850_v1 }
 0x606   : > { %v3652_v27 = vpop.f32.mrb[10].mxu0 }
 0x607   : > { %v1559_v28 = vadd.f32 1e-05, %v3652_v27  ;;  %v1553_v45 = vpop.f32.mrb[11].mxu0 }
 0x608   : > { %v1554_v46 = vadd.f32 1e-05, %v1553_v45 }
 0x609   : > { %4221 = vrsqrt.f32 %v1559_v28 }
 0x60a   : > { %4223 = vrsqrt.f32 %v1554_v46 }
 0x613   : > { %v4222_v31 = vpop.eup %4221 }
 0x614   : > { %v4224_v47 = vpop.eup %4223  ;;  %1568 = vrot.lane.b32.xlu1 %v4222_v31, %s4852_s30 }
 0x615   : > { %1566 = vrot.lane.b32.xlu0 %v4224_v47, %s4852_s30 }
 0x616   : > { %v3690_v49 = vpop.f32.mrb[12].mxu0 }
 0x617   : > { %v1765_v51 = vadd.f32 1e-05, %v3690_v49  ;;  %v1759_v52 = vpop.f32.mrb[13].mxu0 }
 0x618   : > { %v1760_v53 = vadd.f32 1e-05, %v1759_v52  ;;  %1591 = vrot.lane.b32.xlu1 %v3362_v48, %s4852_s30 }
 0x619   : > { %4225 = vrsqrt.f32 %v1765_v51  ;;  %1580 = vrot.lane.b32.xlu0 %v3361_v50, %s4852_s30 }
 0x61a   : > { %4227 = vrsqrt.f32 %v1760_v53 }
 0x623   : > { %v4226_v54 = vpop.eup %4225 }
 0x624   : > { %v4228_v55 = vpop.eup %4227  ;;  %v1771_v56 = vmul.f32 %v4226_v54, %v5619_v2 }
 0x625   : > { %v1770_v58 = vmul.f32 %v4228_v55, %v5622_v4 }
 0x626   : > { %v1773_v61 = vmul.f32 %v3361_v50, %v1771_v56  ;;  %v3728_v62 = vpop.f32.mrb[14].mxu0 }
 0x627   : > { %v1772_v63 = vmul.f32 %v3361_v50, %v1770_v58  ;;  %v1941_v0 = vadd.f32 1e-05, %v3728_v62  ;;  %v1935_v3 = vpop.f32.mrb[15].mxu0 }
 0x628   : > { %v1775_v5 = vadd.f32 %v3362_v48, %v1773_v61  ;;  %v1936_v6 = vadd.f32 1e-05, %v1935_v3 }
 0x629   : > { %v1774_v7 = vadd.f32 %v3362_v48, %v1772_v63  ;;  %4229 = vrsqrt.f32 %v1941_v0 }
 0x62a   : > { %4231 = vrsqrt.f32 %v1936_v6 }
 0x62b   : > { %v1776_v8 = vpack.c.bf16 %v1775_v5, %v1774_v7 }
 0x62d   : > { %1777 = vst.msk [vmem:[#allocation2 + $0x8] sm:$0xff] %vm989_vm1, %v1776_v8 }
 0x633   : > { %v4230_v9 = vpop.eup %4229 }
 0x634   : > { %v4232_v10 = vpop.eup %4231  ;;  %v1947_v11 = vmul.f32 %v4230_v9, %v5639_v33  ;;  %v5693_v35 = vld [vmem:[#allocation2 + $0x8] sm:$0xff] }
 0x635   : > { %v1946_v2 = vmul.f32 %v4232_v10, %v5642_v36  ;;  %v1983_v38 = vsel %vm1975_vm2, %v5693_v35, 0 }
 0x636   : > { %v1949_v4 = vmul.f32 %v3361_v50, %v1947_v11 }
 0x637   : > { %v1948_v12 = vmul.f32 %v3361_v50, %v1946_v2 }
 0x638   : > { %v1951_v13 = vadd.f32 %v3362_v48, %v1949_v4 }
 0x639   : > { %v1950_v14 = vadd.f32 %v3362_v48, %v1948_v12 }
 0x63b   : > { %v1952_v15 = vpack.c.bf16 %v1951_v13, %v1950_v14 }
 0x63d   : > { %1953 = vst.msk [vmem:[#allocation2 + $0x10] sm:$0xff] %vm989_vm1, %v1952_v15 }
 0x644   : > { %v5711_v34 = vld [vmem:[#allocation2 + $0x10] sm:$0xff] }
 0x645   : > { %v1986_v41 = vsel %vm1975_vm2, %v5711_v34, 0 }
 0x686   : > { %v1569_v17 = vpop.permute.xlu1 %1568 }
 0x687   : > { %v1567_v18 = vpop.permute.xlu0 %1566  ;;  %v1573_v19 = vmul.f32 %v1569_v17, %v5630_v24 }
 0x688   : > { %v1572_v20 = vmul.f32 %v1567_v18, %v5625_v16 }
 0x68a   : > { %v1592_v22 = vpop.permute.xlu1 %1591 }
 0x68b   : > { %v1581_v21 = vpop.permute.xlu0 %1580 }
 0x68c   : > { %v1583_v25 = vmul.f32 %v1581_v21, %v1572_v20  ;;  %v1584_v26 = vmul.f32 %v1581_v21, %v1573_v19 }
 0x68e   : > { %v1594_v29 = vadd.f32 %v1592_v22, %v1583_v25  ;;  %v1595_v32 = vadd.f32 %v1592_v22, %v1584_v26 }
 0x690   : > { %v1596_v33 = vpack.c.bf16 %v1595_v32, %v1594_v29 }
 0x692   : > { %1598 = vrot.lane.b32.xlu0 %v1596_v33, %s4852_s30 }
 0x696   : > { %2114 = vrot.lane.b32.xlu0 %v5693_v35, %s4853_s7 }
 0x69a   : > { %2107 = vrot.lane.b32.xlu0 %v5635_v30, %s4853_s7 }
 0x69e   : > { %2366 = vrot.lane.b32.xlu0 %v5693_v35, %s4854_s16 }
 0x6a2   : > { %2359 = vrot.lane.b32.xlu0 %v5635_v30, %s4854_s16 }
 0x704   : > { %v1599_v16 = vpop.permute.xlu0 %1598 }
 0x705   : > { %1601 = vst.msk [vmem:[#allocation2] sm:$0xff] %vm989_vm1, %v1599_v16 }
 0x708   : > { %v2115_v44 = vpop.permute.xlu0 %2114 }
 0x709   : > { %v2125_v27 = vsel %vm1975_vm2, %v2115_v44, 0 }
 0x70c   : > { %v5704_v24 = vld [vmem:[#allocation2] sm:$0xff]  ;;  %v2108_v31 = vpop.permute.xlu0 %2107 }
 0x70d   : > { %2112 = vrot.lane.b32.xlu1 %v5704_v24, %s4853_s7  ;;  %v1980_v36 = vsel %vm1975_vm2, %v5704_v24, 0 }
 0x70e   : > { %3730 = vmatpush3.bf16.xpose.msra.mxu1 %v1980_v36 }
 0x70f   : > { %3731 = vmatprep.subr.bf16.mxu1 %v4850_v1 }
 0x710   : > { %v2367_v48 = vpop.permute.xlu0 %2366 }
 0x711   : > { %2116 = vrot.lane.b32.xlu1 %v5711_v34, %s4853_s7  ;;  %v2377_v49 = vsel %vm1975_vm2, %v2367_v48, 0 }
 0x714   : > { %v2360_v52 = vpop.permute.xlu0 %2359 }
 0x715   : > { %2364 = vrot.lane.b32.xlu1 %v5704_v24, %s4854_s16 }
 0x716   : > { %3732 = vmatpush3.bf16.xpose.msra.mxu1 %v1983_v38 }
 0x717   : > { %3733 = vmatprep.subr.bf16.mxu1 %v4850_v1 }
 0x719   : > { %2368 = vrot.lane.b32.xlu1 %v5711_v34, %s4854_s16 }
 0x71e   : > { %3734 = vmatpush3.bf16.xpose.msra.mxu1 %v1986_v41 }
 0x71f   : > { %3749 = vmatprep.subr.bf16.mxu1 %v4850_v1 }
 0x725   : > { %3736 = vmatmul.mubr.msk.bf16.vlgmr.msra.gmra.mrb[12].mxu1 %vm1975_vm2, %v5635_v30 }
 0x726   : > { %3755 = vmatprep.mubr.msk.bf16.mxu1 %vm4851_vm0, %v4850_v1 }
 0x77f   : > { %v2113_v42 = vpop.permute.xlu1 %2112 }
 0x780   : > { %v2122_v43 = vsel %vm1975_vm2, %v2113_v42, 0 }
 0x781   : > { %3750 = vmatpush3.bf16.xpose.msra.mxu1 %v2122_v43 }
 0x782   : > { %3751 = vmatprep.subr.bf16.mxu1 %v4850_v1 }
 0x783   : > { %v2117_v28 = vpop.permute.xlu1 %2116 }
 0x784   : > { %v2128_v45 = vsel %vm1975_vm2, %v2117_v28, 0 }
 0x787   : > { %v2365_v46 = vpop.permute.xlu1 %2364 }
 0x788   : > { %v2374_v47 = vsel %vm1975_vm2, %v2365_v46, 0 }
 0x789   : > { %3752 = vmatpush3.bf16.xpose.msra.mxu1 %v2125_v27 }
 0x78a   : > { %3753 = vmatprep.subr.bf16.mxu1 %v4850_v1 }
 0x78b   : > { %v2369_v50 = vpop.permute.xlu1 %2368 }
 0x78c   : > { %v2380_v51 = vsel %vm1975_vm2, %v2369_v50, 0 }
 0x791   : > { %3754 = vmatpush3.bf16.xpose.msra.mxu1 %v2128_v45 }
 0x792   : > { %3781 = vmatprep.subr.bf16.mxu1 %v4850_v1 }
 0x798   : > { %3756 = vmatmul.mubr.msk.bf16.vlgmr.msra.gmra.mrb[16].mxu1 %vm1975_vm2, %v2108_v31 }
 0x799   : > { %3782 = vmatpush3.bf16.xpose.msra.mxu1 %v2374_v47  ;;  %3787 = vmatprep.mubr.msk.bf16.mxu1 %vm4851_vm0, %v4850_v1 }
 0x79a   : > { %3783 = vmatprep.subr.bf16.mxu1 %v4850_v1 }
 0x7a1   : > { %3784 = vmatpush3.bf16.xpose.msra.mxu1 %v2377_v49 }
 0x7a2   : > { %3785 = vmatprep.subr.bf16.mxu1 %v4850_v1 }
 0x7a9   : > { %3786 = vmatpush3.bf16.xpose.msra.mxu1 %v2380_v51 }
 0x7aa   : > { %3807 = vmatprep.subr.bf16.mxu1 %v4850_v1 }
 0x7b0   : > { %3788 = vmatmul.mubr.msk.bf16.vlgmr.msra.gmra.mrb[20].mxu1 %vm1975_vm2, %v2360_v52 }
 0x7b1   : > { %3813 = vmatprep.mubr.msk.bf16.mxu1 %vm4851_vm0, %v4850_v1 }
 0x7f8   : > { %v2022_v53 = vpop.f32.mrb[12].mxu1 }
 0x7f9   : > { %v3737_v54 = vpop.f32.mrb[13].mxu1  ;;  %v2030_v55 = vsel %vm2029_vm3, %v2022_v53, -inf }
 0x7fa   : > { %2031 = vmax.xlane.f32.xlu1 %v2030_v55  ;;  %v2025_v56 = vpop.f32.mrb[14].mxu1 }
 0x7fb   : > { %v3738_v58 = vpop.f32.mrb[15].mxu1  ;;  %v2033_v61 = vsel %vm2029_vm3, %v2025_v56, -inf }
 0x7fc   : > { %2034 = vmax.xlane.f32.xlu0 %v2033_v61 }
 0x86b   : > { %v2164_v62 = vpop.f32.mrb[16].mxu1 }
 0x86c   : > { %v3757_v63 = vpop.f32.mrb[17].mxu1  ;;  %v2171_v0 = vsel %vm2029_vm3, %v2164_v62, -inf }
 0x86d   : > { %2172 = vmax.xlane.f32.xlu0 %v2171_v0  ;;  %v2167_v3 = vpop.f32.mrb[18].mxu1 }
 0x86e   : > { %v3758_v5 = vpop.f32.mrb[19].mxu1  ;;  %v2174_v6 = vsel %vm2029_vm3, %v2167_v3, -inf }
 0x86f   : > { %2175 = vmax.xlane.f32.xlu1 %v2174_v6 }
 0x880   : > { %1964 = vrot.lane.b32.xlu1 %v1962_v60, %s4852_s30 }
 0x883   : > { %1958 = vrot.lane.b32.xlu0 %v1956_v40, %s4852_s30  ;;  %v5759_v7 = vpop.f32.mrb[20].mxu1  ;;  %s5917_s30 = scalar_lea.hbm %s6113_s23, %s3412_s24 }
 0x884   : > { %v3789_v8 = vpop.f32.mrb[21].mxu1 }
 0x885   : > { %v5761_v9 = vpop.f32.mrb[22].mxu1 }
 0x886   : > { %v3790_v10 = vpop.f32.mrb[23].mxu1 }
 0x887   : > { %v2032_v2 = vpop.xlane.xlu1 %2031 }
 0x888   : > { %v2036_v12 = vsub.f32 %v2022_v53, %v2032_v2 }
 0x889   : > { %v2035_v11 = vpop.xlane.xlu0 %2034 }
 0x88a   : > { %v2037_v4 = vsub.f32 %v2025_v56, %v2035_v11  ;;  %v2038_v14 = vmul.f32 1.442695, %v2036_v12 }
 0x88c   : > { %v2040_v13 = vmul.f32 1.442695, %v2037_v4 }
 0x88e   : > { %4233 = vpow2.f32 %v2040_v13  ;;  %v4205_v13 = vld [vmem:[%s6107_s4 + $0x8] sm:$0xff]  }
 0x88f   : > { %4235 = vpow2.f32 %v2038_v14 }
 0x898   : > { %v4234_v57 = vpop.eup %4233 }
 0x899   : > { %v4236_v59 = vpop.eup %4235  ;;  %v2045_v60 = vsel %vm2029_vm3, %v4234_v57, 0.0 }
 0x89a   : > { %v2042_v37 = vsel %vm2029_vm3, %v4236_v59, 0.0 }
 0x8a2   : > { %2046 = vadd.xlane.f32.xlu0 %v2045_v60  ;;  %v4206_v60 = vld [vmem:[%s6107_s4] sm:$0xff]  }
 0x8a4   : > { %2043 = vadd.xlane.f32.xlu1 %v2042_v37 }
 0x8fa   : > { %v2173_v39 = vpop.xlane.xlu0 %2172 }
 0x8fb   : > { %v2177_v40 = vsub.f32 %v2164_v62, %v2173_v39 }
 0x8fc   : > { %v2176_v15 = vpop.xlane.xlu1 %2175 }
 0x8fd   : > { %v2179_v17 = vmul.f32 1.442695, %v2177_v40  ;;  %v2178_v26 = vsub.f32 %v2167_v3, %v2176_v15 }
 0x8fe   : > { %v1959_v18 = vpop.permute.xlu0 %1958 }
 0x8ff   : > { %4237 = vpow2.f32 %v2179_v17  ;;  %1961 = vst.msk [vmem:[#allocation3 + $0x8] sm:$0xff] %vm989_vm1, %v1959_v18  ;;  %v2181_v29 = vmul.f32 1.442695, %v2178_v26 }
 0x900   : > { %v1965_v19 = vpop.permute.xlu1 %1964 }
 0x901   : > { %1967 = vst.msk [vmem:[#allocation3 + $0x10] sm:$0xff] %vm989_vm1, %v1965_v19  ;;  %4239 = vpow2.f32 %v2181_v29 }
 0x906   : > { %v5767_v20 = vld [vmem:[#allocation3 + $0x8] sm:$0xff] }
 0x907   : > { %3742 = vmatpush3.bf16.msra.mxu0 %v5767_v20  ;;  %2199 = vrot.lane.b32.xlu1 %v5767_v20, %s4853_s7 }
 0x908   : > { %3743 = vmatprep.subr.bf16.mxu0 %v4850_v1  ;;  %v5774_v25 = vld [vmem:[#allocation3 + $0x10] sm:$0xff] }
 0x909   : > { %v4238_v21 = vpop.eup %4237 }
 0x90a   : > { %v2183_v22 = vsel %vm2029_vm3, %v4238_v21, 0.0 }
 0x90b   : > { %2184 = vadd.xlane.f32.xlu0 %v2183_v22  ;;  %3744 = vmatpush3.bf16.msra.mxu0 %v5774_v25  ;;  %v4240_v32 = vpop.eup %4239 }
 0x90c   : > { %3759 = vmatprep.subr.bf16.mxu0 %v4850_v1  ;;  %v2186_v33 = vsel %vm2029_vm3, %v4240_v32, 0.0 }
 0x921   : > { %2197 = vrot.lane.b32.xlu0 %v5674_v23, %s4853_s7 }
 0x925   : > { %2568 = vrot.lane.b32.xlu0 %v5704_v24, %s4855_s2  ;;  %v2423_v24 = vsel %vm2029_vm3, %v5759_v7, -inf }
 0x929   : > { %2572 = vrot.lane.b32.xlu0 %v5711_v34, %s4855_s2  ;;  %v2426_v34 = vsel %vm2029_vm3, %v5761_v9, -inf }
 0x92b   : > { %2187 = vadd.xlane.f32.xlu1 %v2186_v33 }
 0x92f   : > { %v2047_v16 = vpop.xlane.xlu0 %2046 }
 0x930   : > { %4241 = vrcp.f32 %v2047_v16 }
 0x931   : > { %v2044_v36 = vpop.xlane.xlu1 %2043 }
 0x932   : > { %4243 = vrcp.f32 %v2044_v36 }
 0x93a   : > { %v4242_v38 = vpop.eup %4241 }
 0x93b   : > { %v2051_v42 = vmul.f32 %v4242_v38, %v4234_v57 }
 0x93c   : > { %v4244_v41 = vpop.eup %4243  ;;  %2201 = vrot.lane.b32.xlu1 %v5774_v25, %s4853_s7  ;;  %s4856_s7 = smov [#allocation30]  }
 0x93d   : > { %v2050_v43 = vmul.f32 %v4244_v41, %v4236_v59 }
 0x93f   : > { %v2052_v44 = vpack.c.bf16 %v2051_v42, %v2050_v43  ;;  %v4207_v42 = vld [vmem:[%s6107_s4 + $0x10] sm:$0xff]  }
 0x940   : > { %2570 = vrot.lane.b32.xlu1 %v5693_v35, %s4855_s2 }
 0x941   : > { %3746 = vmatmul.mubr.msk.bf16.vlgmr.msra.gmra.mrb[16].mxu0 %vm2029_vm3, %v2052_v44 }
 0x942   : > { %3765 = vmatprep.mubr.msk.bf16.mxu0 %vm4851_vm0, %v4850_v1 }
 0x944   : > { %2563 = vrot.lane.b32.xlu1 %v5635_v30, %s4855_s2 }
 0x948   : > { %2424 = vmax.xlane.f32.xlu0 %v2423_v24 }
 0x968   : > { %2427 = vmax.xlane.f32.xlu1 %v2426_v34 }
 0x979   : > { %2449 = vrot.lane.b32.xlu1 %v5674_v23, %s4854_s16  ;;  %v2200_v30 = vpop.permute.xlu1 %2199 }
 0x97d   : > { %2453 = vrot.lane.b32.xlu1 %v5774_v25, %s4854_s16 }
 0x998   : > { %v2185_v35 = vpop.xlane.xlu0 %2184 }
 0x999   : > { %4245 = vrcp.f32 %v2185_v35 }
 0x99c   : > { %v2198_v27 = vpop.permute.xlu0 %2197 }
 0x99d   : > { %3760 = vmatpush3.bf16.msra.mxu0 %v2198_v27 }
 0x99e   : > { %3761 = vmatprep.subr.bf16.mxu0 %v4850_v1 }
 0x9a0   : > { %v2569_v28 = vpop.permute.xlu0 %2568 }
 0x9a1   : > { %v2578_v45 = vsel %vm1975_vm2, %v2569_v28, 0  ;;  %3762 = vmatpush3.bf16.msra.mxu0 %v2200_v30 }
 0x9a2   : > { %3808 = vmatpush3.bf16.xpose.msra.mxu1 %v2578_v45  ;;  %3763 = vmatprep.subr.bf16.mxu0 %v4850_v1 }
 0x9a3   : > { %3809 = vmatprep.subr.bf16.mxu1 %v4850_v1  ;;  %v4246_v48 = vpop.eup %4245 }
 0x9a4   : > { %v2191_v51 = vmul.f32 %v4246_v48, %v4238_v21  ;;  %v2573_v53 = vpop.permute.xlu0 %2572 }
 0x9a5   : > { %v2584_v55 = vsel %vm1975_vm2, %v2573_v53, 0 }
 0x9b8   : > { %v2188_v46 = vpop.xlane.xlu1 %2187 }
 0x9b9   : > { %4247 = vrcp.f32 %v2188_v46 }
 0x9bc   : > { %v2202_v31 = vpop.permute.xlu1 %2201 }
 0x9bd   : > { %3764 = vmatpush3.bf16.msra.mxu0 %v2202_v31 }
 0x9be   : > { %3769 = vmatprep.subr.bf16.mxu0 %v4850_v1 }
 0x9c0   : > { %v2571_v47 = vpop.permute.xlu1 %2570 }
 0x9c1   : > { %v2581_v49 = vsel %vm1975_vm2, %v2571_v47, 0 }
 0x9c2   : > { %3810 = vmatpush3.bf16.xpose.msra.mxu1 %v2581_v49 }
 0x9c3   : > { %v4248_v50 = vpop.eup %4247  ;;  %3811 = vmatprep.subr.bf16.mxu1 %v4850_v1 }
 0x9c4   : > { %v2192_v52 = vmul.f32 %v4248_v50, %v4240_v32  ;;  %v2564_v56 = vpop.permute.xlu1 %2563 }
 0x9c6   : > { %v2193_v54 = vpack.c.bf16 %v2192_v52, %v2191_v51 }
 0x9c8   : > { %3766 = vmatmul.mubr.msk.bf16.vlgmr.msra.gmra.mrb[20].mxu0 %vm2029_vm3, %v2193_v54 }
 0x9c9   : > { %3771 = vmatprep.mubr.msk.bf16.mxu0 %vm4851_vm0, %v4850_v1  ;;  %3770 = vmatpush3.bf16.msra.mxu0 %v4205_v13 }
 0x9ca   : > { %3812 = vmatpush3.bf16.xpose.msra.mxu1 %v2584_v55  ;;  %3775 = vmatprep.subr.bf16.mxu0 %v4850_v1 }
 0x9cb   : > { %3845 = vmatprep.subr.bf16.mxu1 %v4850_v1 }
 0x9d1   : > { %3814 = vmatmul.mubr.msk.bf16.vlgmr.msra.gmra.mrb[24].mxu1 %vm1975_vm2, %v2564_v56 }
 0x9d2   : > { %3853 = vmatprep.mubr.msk.bf16.mxu1 %vm4851_vm0, %v4850_v1 }
 0x9d5   : > { %v2425_v58 = vpop.xlane.xlu0 %2424 }
 0x9d6   : > { %v2429_v61 = vsub.f32 %v5759_v7, %v2425_v58 }
 0x9d8   : > { %v2431_v62 = vmul.f32 1.442695, %v2429_v61 }
 0x9da   : > { %4249 = vpow2.f32 %v2431_v62 }
 0x9e4   : > { %v4250_v63 = vpop.eup %4249 }
 0x9e5   : > { %v2435_v0 = vsel %vm2029_vm3, %v4250_v63, 0.0 }
 0x9e6   : > { %2436 = vadd.xlane.f32.xlu0 %v2435_v0 }
 0x9f5   : > { %v2428_v3 = vpop.xlane.xlu1 %2427 }
 0x9f6   : > { %v2430_v5 = vsub.f32 %v5761_v9, %v2428_v3 }
 0x9f8   : > { %v2433_v6 = vmul.f32 1.442695, %v2430_v5 }
 0x9f9   : > { %v2450_v26 = vpop.permute.xlu1 %2449 }
 0x9fa   : > { %4251 = vpow2.f32 %v2433_v6 }
 0x9fd   : > { %v2454_v36 = vpop.permute.xlu1 %2453 }
 0xa04   : > { %v4252_v8 = vpop.eup %4251 }
 0xa05   : > { %v2438_v10 = vsel %vm2029_vm3, %v4252_v8, 0.0 }
 0xa06   : > { %2439 = vadd.xlane.f32.xlu0 %v2438_v10 }
 0xa14   : > { %v2090_v11 = vpop.f32.mrb[16].mxu0 }
 0xa15   : > { %v3747_v2 = vpop.f32.mrb[17].mxu0 }
 0xa16   : > { %v2093_v4 = vpop.f32.mrb[18].mxu0  ;;  %v4208_v2 = vld [vmem:[%s6107_s4 + $0x18] sm:$0xff]  }
 0xa17   : > { %v2097_v12 = vpack.c.bf16 %v2093_v4, %v2090_v11  ;;  %v3748_v7 = vpop.f32.mrb[19].mxu0 }
 0xa1c   : > { %2451 = vrot.lane.b32.xlu0 %v5767_v20, %s4854_s16  ;;  %s4733_s16 = sshll.u32 %s4856_s7, 4  ;;  %s4734_s16 = int_to_ptr.vmem [resolvable:$false] %s4733_s16 }
 0xa1d   : > { %p4736_p5 = scmp.lt.s32.totalorder %s5919_s12, %s4734_s16 }
 0xa73   : > { %v2437_v9 = vpop.xlane.xlu0 %2436 }
 0xa93   : > { %v2440_v37 = vpop.xlane.xlu0 %2439 }
 0xa94   : > { %4253 = vrcp.f32 %v2440_v37 }
 0xa95   : > { %4255 = vrcp.f32 %v2437_v9 }
 0xa97   : > { %v2452_v32 = vpop.permute.xlu0 %2451 }
 0xa9b   : > { %v2243_v14 = vpop.f32.mrb[20].mxu0 }
 0xa9c   : > { %v3767_v57 = vpop.f32.mrb[21].mxu0 }
 0xa9d   : > { %v2246_v59 = vpop.f32.mrb[22].mxu0 }
 0xa9e   : > { %v2250_v39 = vpack.c.bf16 %v2246_v59, %v2243_v14  ;;  %v3768_v40 = vpop.f32.mrb[23].mxu0  ;;  %v4254_v29 = vpop.eup %4253 }
 0xa9f   : > { %v4256_v33 = vpop.eup %4255  ;;  %v2444_v16 = vmul.f32 %v4254_v29, %v4252_v8 }
 0xaa0   : > { %3772 = vmatmul.mubr.msk.bf16.vlgmr.msra.gmra.mrb[24].mxu0 %vm1975_vm2, %v2250_v39  ;;  %v2443_v38 = vmul.f32 %v4256_v33, %v4250_v63 }
 0xaa1   : > { %3776 = vmatpush3.bf16.msra.mxu0 %v4206_v60  ;;  %3777 = vmatprep.mubr.msk.bf16.mxu0 %vm4851_vm0, %v4850_v1 }
 0xaa2   : > { %3791 = vmatprep.subr.bf16.mxu0 %v4850_v1  ;;  %v2445_v41 = vpack.c.bf16 %v2444_v16, %v2443_v38 }
 0xaa4   : > { %v2620_v15 = vpop.f32.mrb[24].mxu1 }
 0xaa5   : > { %v3815_v17 = vpop.f32.mrb[25].mxu1  ;;  %v2627_v18 = vsel %vm2029_vm3, %v2620_v15, -inf }
 0xaa6   : > { %2628 = vmax.xlane.f32.xlu1 %v2627_v18  ;;  %v2623_v19 = vpop.f32.mrb[26].mxu1 }
 0xaa7   : > { %v3816_v21 = vpop.f32.mrb[27].mxu1  ;;  %v2630_v22 = vsel %vm2029_vm3, %v2623_v19, -inf }
 0xaa8   : > { %3778 = vmatmul.mubr.msk.bf16.vlgmr.msra.gmra.mrb[28].mxu0 %vm1975_vm2, %v2097_v12  ;;  %2631 = vmax.xlane.f32.xlu0 %v2630_v22 }
 0xaa9   : > { %3792 = vmatpush3.bf16.msra.mxu0 %v2450_v26  ;;  %3797 = vmatprep.mubr.msk.bf16.mxu0 %vm4851_vm0, %v4850_v1 }
 0xaaa   : > { %3793 = vmatprep.subr.bf16.mxu0 %v4850_v1 }
 0xaad   : > { %3794 = vmatpush3.bf16.msra.mxu0 %v2452_v32  ;;  %v4273_v32 = vld [vmem:[%s5451_s18] sm:$0xff] }
 0xaae   : > { %3795 = vmatprep.subr.bf16.mxu0 %v4850_v1 }
 0xab1   : > { %3796 = vmatpush3.bf16.msra.mxu0 %v2454_v36  ;;  %v4274_v36 = vld [vmem:[%s5451_s18 + $0x8] sm:$0xff]  ;;  %s6108_s18 = sld [smem:[#allocation63_spill]] }
 0xab2   : > { %3801 = vmatprep.subr.bf16.mxu0 %v4850_v1 }
 0xab4   : > { %3798 = vmatmul.mubr.msk.bf16.vlgmr.msra.gmra.mrb[32].mxu0 %vm2029_vm3, %v2445_v41 }
 0xab5   : > { %3803 = vmatprep.mubr.msk.bf16.mxu0 %vm4851_vm0, %v4850_v1  ;;  %3802 = vmatpush3.bf16.msra.mxu0 %v4207_v42 }
 0xab6   : > { %3817 = vmatprep.subr.bf16.mxu0 %v4850_v1 }
 0xab7   : > { %2655 = vrot.lane.b32.xlu1 %v5767_v20, %s4855_s2 }
 0xb33   : > { %v2629_v43 = vpop.xlane.xlu1 %2628 }
 0xb34   : > { %v2633_v44 = vsub.f32 %v2620_v15, %v2629_v43  ;;  %v3387_v15 = vld [vmem:[#allocation22] ss:$0 sm:$0xff] }
 0xb35   : > { %v2632_v24 = vpop.xlane.xlu0 %2631 }
 0xb36   : > { %v2635_v34 = vmul.f32 1.442695, %v2633_v44  ;;  %v2634_v35 = vsub.f32 %v2623_v19, %v2632_v24 }
 0xb38   : > { %4257 = vpow2.f32 %v2635_v34  ;;  %v2637_v27 = vmul.f32 1.442695, %v2634_v35 }
 0xb3a   : > { %4259 = vpow2.f32 %v2637_v27 }
 0xb42   : > { %v4258_v30 = vpop.eup %4257 }
 0xb43   : > { %v2639_v28 = vsel %vm2029_vm3, %v4258_v30, 0.0 }
 0xb44   : > { %v4260_v45 = vpop.eup %4259  ;;  %2640 = vadd.xlane.f32.xlu0 %v2639_v28 }
 0xb45   : > { %v2642_v20 = vsel %vm2029_vm3, %v4260_v45, 0.0 }
 0xb46   : > { %2643 = vadd.xlane.f32.xlu1 %v2642_v20  ;;  %v4209_v20 = vld [vmem:[#allocation27] sm:$0xff]  }
 0xb57   : > { %2657 = vrot.lane.b32.xlu1 %v5774_v25, %s4855_s2 }
 0xb5a   : > { %2653 = vrot.lane.b32.xlu0 %v5674_v23, %s4855_s2  ;;  %v2656_v23 = vpop.permute.xlu1 %2655  ;;  %s4735_s2 = scalar_lea.vmem %s4734_s16, 512 }
 0xb5b   : > { %p4737_p8 = scmp.lt.s32.totalorder %s4735_s2, %s4729_s0 }
 0xb5d   : > { %p4738_p1 = por %p4737_p8, %p4736_p5 }
 0xb5f   : > { %p4739_p2 = pnand %p4738_p1, %p4732_p0 }
 0xb73   : > { %v2296_v46 = vpop.f32.mrb[24].mxu0 }
 0xb74   : > { %v3773_v31 = vpop.f32.mrb[25].mxu0 }
 0xb75   : > { %v2299_v47 = vpop.f32.mrb[26].mxu0  ;;  %v4211_v31 = vld [vmem:[#allocation27 + $0x10] sm:$0xff]  }
 0xb76   : > { %v3774_v48 = vpop.f32.mrb[27].mxu0 }
 0xb77   : > { %v4213_v48 = vld [vmem:[%s6108_s18] sm:$0xff]  }
 0xb78   : > { %3846 = vmatpush3.bf16.msra.mxu1 %v4213_v48 }
 0xb79   : > { %3847 = vmatprep.subr.bf16.mxu1 %v4850_v1 }
 0xb7b   : > { %v2346_v49 = vpop.f32.mrb[28].mxu0 }
 0xb7c   : > { %v2347_v50 = vadd.f32 %v2346_v49, %v2296_v46  ;;  %v3779_v51 = vpop.f32.mrb[29].mxu0  ;;  %v4210_v46 = vld [vmem:[#allocation27 + $0x8] sm:$0xff]  }
 0xb7d   : > { %v2349_v52 = vpop.f32.mrb[30].mxu0  ;;  %v4214_v49 = vld [vmem:[%s6108_s18 + $0x8] sm:$0xff]  }
 0xb7e   : > { %v2350_v53 = vadd.f32 %v2349_v52, %v2299_v47  ;;  %v3780_v54 = vpop.f32.mrb[31].mxu0  ;;  %v4212_v47 = vld [vmem:[#allocation27 + $0x18] sm:$0xff]   ;;  %3848 = vmatpush3.bf16.msra.mxu1 %v4214_v49 }
 0xb7f   : > { %3849 = vmatprep.subr.bf16.mxu1 %v4850_v1 }
 0xb87   : > { %v2495_v55 = vpop.f32.mrb[32].mxu0 }
 0xb88   : > { %v3799_v56 = vpop.f32.mrb[33].mxu0 }
 0xb89   : > { %v2498_v58 = vpop.f32.mrb[34].mxu0 }
 0xb8a   : > { %v2502_v61 = vpack.c.bf16 %v2498_v58, %v2495_v55  ;;  %v3800_v62 = vpop.f32.mrb[35].mxu0 }
 0xb8c   : > { %3804 = vmatmul.mubr.msk.bf16.vlgmr.msra.gmra.mrb[36].mxu0 %vm1975_vm2, %v2502_v61  ;;  %v3388_v61 = vld [vmem:[#allocation24] ss:$0 sm:$0xff] }
 0xb8d   : > { %3823 = vmatprep.mubr.msk.bf16.mxu0 %vm4851_vm0, %v4850_v1 }
 0xbd1   : > { %v2641_v25 = vpop.xlane.xlu0 %2640 }
 0xbd2   : > { %4261 = vrcp.f32 %v2641_v25 }
 0xbd3   : > { %v2644_v63 = vpop.xlane.xlu1 %2643 }
 0xbd4   : > { %4263 = vrcp.f32 %v2644_v63  ;;  %v3389_v63 = vld [vmem:[#allocation25] ss:$0 sm:$0xff] }
 0xbd5   : > { %v2654_v0 = vpop.permute.xlu0 %2653 }
 0xbd6   : > { %3818 = vmatpush3.bf16.msra.mxu0 %v2654_v0 }
 0xbd7   : > { %3819 = vmatprep.subr.bf16.mxu0 %v4850_v1  ;;  %v2658_v5 = vpop.permute.xlu1 %2657 }
 0xbda   : > { %3820 = vmatpush3.bf16.msra.mxu0 %v2656_v23 }
 0xbdb   : > { %3821 = vmatprep.subr.bf16.mxu0 %v4850_v1 }
 0xbdc   : > { %v4262_v3 = vpop.eup %4261 }
 0xbdd   : > { %v2647_v8 = vmul.f32 %v4262_v3, %v4258_v30 }
 0xbde   : > { %v4264_v6 = vpop.eup %4263  ;;  %3822 = vmatpush3.bf16.msra.mxu0 %v2658_v5 }
 0xbdf   : > { %v2648_v10 = vmul.f32 %v4264_v6, %v4260_v45  ;;  %3827 = vmatprep.subr.bf16.mxu0 %v4850_v1 }
 0xbe1   : > { %v2649_v11 = vpack.c.bf16 %v2648_v10, %v2647_v8  ;;  %v4215_v8 = vld [vmem:[%s6108_s18 + $0x10] sm:$0xff]   ;;  %v4216_v10 = vld [vmem:[%s6108_s18 + $0x18] sm:$0xff]  }
 0xbe2   : > { %3850 = vmatpush3.bf16.msra.mxu1 %v4215_v8 }
 0xbe3   : > { %3824 = vmatmul.mubr.msk.bf16.vlgmr.msra.gmra.mrb[40].mxu0 %vm2029_vm3, %v2649_v11  ;;  %3851 = vmatprep.subr.bf16.mxu1 %v4850_v1  ;;  %v3390_v11 = vld [vmem:[#allocation28] ss:$0 sm:$0xff] }
 0xbe4   : > { %3828 = vmatpush3.bf16.msra.mxu0 %v4208_v2  ;;  %3829 = vmatprep.mubr.msk.bf16.mxu0 %vm4851_vm0, %v4850_v1 }
 0xbe5   : > { %3833 = vmatprep.subr.bf16.mxu0 %v4850_v1 }
 0xbe6   : > { %3852 = vmatpush3.bf16.msra.mxu1 %v4216_v10 }
 0xc5f   : > { %v2548_v4 = vpop.f32.mrb[36].mxu0 }
 0xc60   : > { %v2555_v12 = vadd.f32 %v2548_v4, %v2347_v50  ;;  %v3805_v7 = vpop.f32.mrb[37].mxu0 }
 0xc61   : > { %v2551_v13 = vpop.f32.mrb[38].mxu0 }
 0xc62   : > { %v2556_v9 = vadd.f32 %v2551_v13, %v2350_v53  ;;  %v3806_v14 = vpop.f32.mrb[39].mxu0 }
 0xcb6   : > { %v2699_v57 = vpop.f32.mrb[40].mxu0 }
 0xcb7   : > { %v3825_v59 = vpop.f32.mrb[41].mxu0 }
 0xcb8   : > { %v2702_v60 = vpop.f32.mrb[42].mxu0 }
 0xcb9   : > { %v2706_v37 = vpack.c.bf16 %v2702_v60, %v2699_v57  ;;  %v3826_v39 = vpop.f32.mrb[43].mxu0 }
 0xcbb   : > { %3830 = vmatmul.mubr.msk.bf16.vlgmr.msra.gmra.mrb[44].mxu0 %vm1975_vm2, %v2706_v37 }
 0xcbc   : > { %3841 = vmatprep.mubr.msk.bf16.mxu0 %vm4851_vm0, %v4850_v1  ;;  %3834 = vmatpush3.bf16.msra.mxu0 %v4209_v20 }
 0xcbd   : > { %3835 = vmatprep.subr.bf16.mxu0 %v4850_v1 }
 0xcc0   : > { %3836 = vmatpush3.bf16.msra.mxu0 %v4210_v46 }
 0xcc1   : > { %3837 = vmatprep.subr.bf16.mxu0 %v4850_v1 }
 0xcc4   : > { %3838 = vmatpush3.bf16.msra.mxu0 %v4211_v31  ;;  %v3403_v31 = vld [vmem:[%s6111_s5] ss:$0 sm:$0xff] }
 0xcc5   : > { %3839 = vmatprep.subr.bf16.mxu0 %v4850_v1  ;;  %v3396_v1 = vld [vmem:[%s6109_s3] ss:$0 sm:$0xff] }
 0xcc8   : > { %3840 = vmatpush3.bf16.msra.mxu0 %v4212_v47 }
 0xd8e   : > { %v2752_v40 = vpop.f32.mrb[44].mxu0 }
 0xd8f   : > { %v2759_v17 = vadd.f32 %v2752_v40, %v2555_v12  ;;  %v3831_v18 = vpop.f32.mrb[45].mxu0 }
 0xd90   : > { %v2755_v19 = vpop.f32.mrb[46].mxu0 }
 0xd91   : > { %v2768_v21 = vadd.f32 %v3387_v15, %v2759_v17  ;;  %v2760_v22 = vadd.f32 %v2755_v19, %v2556_v9  ;;  %v3832_v26 = vpop.f32.mrb[47].mxu0 }
 0xd93   : > { %v2769_v29 = vadd.f32 %v3387_v15, %v2760_v22  ;;  %v2770_v33 = vadd.f32 %v4273_v32, %v2768_v21 }
 0xd95   : > { %v2774_v16 = vsel %vm989_vm1, %v2770_v33, 0.0  ;;  %v2771_v38 = vadd.f32 %v4274_v36, %v2769_v29 }
 0xd96   : > { %2775 = vadd.xlane.f32.xlu0 %v2774_v16 }
 0xd97   : > { %v2777_v41 = vsel %vm989_vm1, %v2771_v38, 0.0 }
 0xd98   : > { %2778 = vadd.xlane.f32.xlu1 %v2777_v41 }
 0xe23   : > { %v2776_v42 = vpop.xlane.xlu0 %2775 }
 0xe24   : > { %v2781_v43 = vmul.f32 0.015625, %v2776_v42 }
 0xe25   : > { %v2779_v44 = vpop.xlane.xlu1 %2778 }
 0xe26   : > { %v2783_v24 = vsub.f32 %v2770_v33, %v2781_v43  ;;  %v2782_v34 = vmul.f32 0.015625, %v2779_v44 }
 0xe28   : > { %v2784_v35 = vsub.f32 %v2771_v38, %v2782_v34  ;;  %v2785_v27 = vmul.f32 %v2783_v24, %v2783_v24 }
 0xe2a   : > { %v2787_v30 = vsel %vm989_vm1, %v2785_v27, 0.0  ;;  %v2786_v28 = vmul.f32 %v2784_v35, %v2784_v35 }
 0xe2b   : > { %2788 = vadd.xlane.f32.xlu0 %v2787_v30 }
 0xe2c   : > { %v2790_v45 = vsel %vm989_vm1, %v2786_v28, 0.0 }
 0xe2f   : > { %2791 = vadd.xlane.f32.xlu0 %v2790_v45  ;;  %v3402_v45 = vld [vmem:[%s6110_s1] ss:$0 sm:$0xff] }
 0xeb8   : > { %v2789_v50 = vpop.xlane.xlu0 %2788 }
 0xeb9   : > { %v2793_v51 = vmul.f32 0.015625, %v2789_v50 }
 0xebb   : > { %v2795_v52 = vadd.f32 1e-05, %v2793_v51 }
 0xebc   : > { %v2792_v53 = vpop.xlane.xlu0 %2791 }
 0xebd   : > { %4265 = vrsqrt.f32 %v2795_v52  ;;  %v2794_v54 = vmul.f32 0.015625, %v2792_v53 }
 0xebf   : > { %v2796_v55 = vadd.f32 1e-05, %v2794_v54 }
 0xec1   : > { %4267 = vrsqrt.f32 %v2796_v55 }
 0xec7   : > { %v4266_v56 = vpop.eup %4265 }
 0xec8   : > { %v2799_v58 = vmul.f32 %v4266_v56, %v2783_v24 }
 0xeca   : > { %v2807_v23 = vmul.f32 %v3388_v61, %v2799_v58 }
 0xecb   : > { %v4268_v62 = vpop.eup %4267 }
 0xecc   : > { %v2800_v25 = vmul.f32 %v4268_v62, %v2784_v35  ;;  %v2815_v3 = vadd.f32 %v3389_v63, %v2807_v23 }
 0xece   : > { %v2808_v0 = vmul.f32 %v3388_v61, %v2800_v25 }
 0xed0   : > { %v2816_v5 = vadd.f32 %v3389_v63, %v2808_v0 }
 0xed2   : > { %v2817_v6 = vpack.c.bf16 %v2816_v5, %v2815_v3 }
 0xed4   : > { %3842 = vmatmul.mubr.msk.bf16.vlgmr.msra.gmra.mrb[48].mxu0 %vm989_vm1, %v2817_v6 }
 0xfa7   : > { %v2894_v2 = vpop.f32.mrb[48].mxu0 }
 0xfa8   : > { %v2895_v4 = vadd.f32 %v3390_v11, %v2894_v2  ;;  %v3843_v12 = vpop.f32.mrb[49].mxu0 }
 0xfa9   : > { %v2897_v7 = vpop.f32.mrb[50].mxu0 }
 0xfaa   : > { %v2898_v13 = vadd.f32 %v3390_v11, %v2897_v7  ;;  %v3844_v9 = vpop.f32.mrb[51].mxu0  ;;  %v2901_v14 = vmax.f32 %v2895_v4, 0.0 }
 0xfac   : > { %v2902_v57 = vmax.f32 %v2898_v13, 0.0 }
 0xfae   : > { %v2903_v59 = vpack.c.bf16 %v2902_v57, %v2901_v14 }
 0xfb0   : > { %3854 = vmatmul.mubr.msk.bf16.vlgmr.msra.gmra.mrb[28].mxu1 %vm989_vm1, %v2903_v59 }
0x1083   : > { %v2980_v60 = vpop.f32.mrb[28].mxu1 }
0x1084   : > { %v2981_v37 = vadd.f32 %v3396_v1, %v2980_v60  ;;  %v3855_v39 = vpop.f32.mrb[29].mxu1 }
0x1085   : > { %v2983_v40 = vpop.f32.mrb[30].mxu1 }
0x1086   : > { %v2984_v15 = vadd.f32 %v3396_v1, %v2983_v40  ;;  %v3856_v17 = vpop.f32.mrb[31].mxu1  ;;  %v2987_v18 = vadd.f32 %v2981_v37, %v2815_v3 }
0x1088   : > { %v2991_v19 = vsel %vm989_vm1, %v2987_v18, 0.0  ;;  %v2988_v21 = vadd.f32 %v2984_v15, %v2816_v5 }
0x1089   : > { %2992 = vadd.xlane.f32.xlu1 %v2991_v19 }
0x108a   : > { %v2994_v22 = vsel %vm989_vm1, %v2988_v21, 0.0 }
0x108b   : > { %2995 = vadd.xlane.f32.xlu0 %v2994_v22 }
0x1116   : > { %v2993_v26 = vpop.xlane.xlu1 %2992 }
0x1117   : > { %v2997_v29 = vmul.f32 0.015625, %v2993_v26 }
0x1118   : > { %v2996_v32 = vpop.xlane.xlu0 %2995 }
0x1119   : > { %v2999_v33 = vsub.f32 %v2987_v18, %v2997_v29  ;;  %v2998_v16 = vmul.f32 0.015625, %v2996_v32 }
0x111b   : > { %v3000_v36 = vsub.f32 %v2988_v21, %v2998_v16  ;;  %v3001_v38 = vmul.f32 %v2999_v33, %v2999_v33 }
0x111d   : > { %v3003_v41 = vsel %vm989_vm1, %v3001_v38, 0.0  ;;  %v3002_v42 = vmul.f32 %v3000_v36, %v3000_v36 }
0x111e   : > { %3004 = vadd.xlane.f32.xlu1 %v3003_v41 }
0x111f   : > { %v3006_v43 = vsel %vm989_vm1, %v3002_v42, 0.0 }
0x1120   : > { %3007 = vadd.xlane.f32.xlu0 %v3006_v43 }
0x11ab   : > { %v3005_v44 = vpop.xlane.xlu1 %3004 }
0x11ac   : > { %v3009_v24 = vmul.f32 0.015625, %v3005_v44 }
0x11ad   : > { %v3008_v34 = vpop.xlane.xlu0 %3007 }
0x11ae   : > { %v3011_v35 = vadd.f32 1e-05, %v3009_v24  ;;  %v3010_v27 = vmul.f32 0.015625, %v3008_v34 }
0x11b0   : > { %4269 = vrsqrt.f32 %v3011_v35  ;;  %v3012_v30 = vadd.f32 1e-05, %v3010_v27 }
0x11b2   : > { %4271 = vrsqrt.f32 %v3012_v30 }
0x11ba   : > { %v4270_v28 = vpop.eup %4269 }
0x11bb   : > { %v3015_v20 = vmul.f32 %v4270_v28, %v2999_v33 }
0x11bc   : > { %v4272_v46 = vpop.eup %4271 }
0x11bd   : > { %v3023_v47 = vmul.f32 %v3402_v45, %v3015_v20  ;;  %v3016_v48 = vmul.f32 %v4272_v46, %v3000_v36 }
0x11bf   : > { %v3031_v49 = vadd.f32 %v3403_v31, %v3023_v47  ;;  %v3024_v50 = vmul.f32 %v3402_v45, %v3016_v48 }
0x11c1   : > { %v3032_v51 = vadd.f32 %v3403_v31, %v3024_v50  ;;  %3033 = vst.msk [vmem:[%s924_s21] sm:$0xff] %vm989_vm1, %v3031_v49 }
0x11c3   : > { %3034 = vst.msk [vmem:[%s924_s21 + $0x8] sm:$0xff] %vm989_vm1, %v3032_v51 }
0x11c4   : > { %4742 = shalt.err (!%p4739_p2)
}
0x11c5   : > { %s4743_s3 = scalar_lea.hbm %s5917_s30, 256  ;;  %s4747_s1 = scalar_lea.hbm %s6113_s23, 512 }
0x11c6   : > { %p4744_p4 = scmp.ne.s32.totalorder %s5917_s30, %s4743_s3  ;;  %p4748_p9 = scmp.lt.u32.totalorder %s5917_s30, %s6113_s23 }
0x11c7   : > { %p4749_p6 = scmp.lt.u32.totalorder %s4747_s1, %s4743_s3  ;;  %p4751_p11 = scmp.lt.u32.totalorder %s4743_s3, %s5917_s30 }
0x11c8   : > { %p4745_p10 = pnand %p4744_p4, %p6114_p3 }
0x11c9   : > { %p4750_p13 = por %p4749_p6, %p4748_p9 }
0x11ca   : > { %p4746_p7 = pneg %p4745_p10 }
0x11cb   : > { %p4752_p12 = por %p4751_p11, %p4750_p13 }
0x11cd   : > { %p4753_p0 = pnand %p4752_p12, %p4746_p7 }
0x11cf   : > { %4756 = shalt.err (!%p4753_p0)
}
0x11d0   : > { %s4857_s5 = smov 128   ;;  %s4858_s24 = smov 8  }
0x11d1   : > { %4043 = dma.vmem_to_hbm [thread:$0]  (%p6114_p3), %s5919_s12, 256, %s5917_s30, %s3036_s29, %s4857_s5, %s4857_s5, %s4858_s24  }
0x11d2 PF: > { %s6115_s21 = sld [smem:[#allocation41_spill]]  ;;  %s6116_s14 = sld [smem:[#allocation47_spill]] }
0x11d3   : > { %s6117_s17 = sld [smem:[#allocation42_spill]] }
0x11d8   : > { %s3064_s0 = sand.u32 1, %s6115_s21   ;;  %p6118_p5 = scmp.ne.s32.totalorder %s6116_s14, 0 }
0x11d9   : > { %p6119_p8 = scmp.ge.s32.totalorder %s6117_s17, 2  ;;  %s3065_s7 = scalar_lea.sflag [#allocation6], %s3064_s0 }
0x11db   : > { %p4096_p1 = pnand %p6119_p8, %p6118_p5 }
0x11dd   : > { %4810 = dma.done.wait (!%p4096_p1), %s3065_s7, 256  }
0x11de   : > { %4812 = vsyncadd (!%p4096_p1), %s3065_s7, 4294967040  ;;  %s6120_s27 = sld [smem:[#allocation44_spill]]  ;;  %s6121_s16 = sld [smem:[#allocation45_spill]] }
0x11df   : > { %s6122_s2 = smov %s4819_s25  ;;  %s6123_s25 = smov %s4823_s26 }
0x11e4   : > { %p44_p2 = scmp.ge.s32.totalorder %s6120_s27, 4   ;;  %s6124_s26 = smov %s6121_s16 }
0x11e6   :  { %46 = sbr.rel (!%p44_p2) target bundleno = 35 (0x23), region = 225 }
0x11ed   :  { %3070 = vsyncpa [#allocation5], 1 }
0x11ee   :  { %3072 = vsyncpa [#allocation5 + $0x1], 1 }
0x11ef   :  { %3073 = vsyncpa [#allocation8], 1 }
0x11f0   :  { %3075 = vsyncpa [#allocation8 + $0x1], 1 }
0x11f1   :  { %3076 = vsyncpa [#allocation11], 1 }
0x11f2   :  { %3077 = vsyncpa [#allocation14], 1 }
0x11f3   :  { %3078 = vsyncpa [#allocation17], 1 }
0x11f4   :  { %3079 = vsyncpa [#allocation20], 1 }
0x11f5   :  { %3080 = vsyncpa [#allocation23], 1 }
0x11f6   :  { %3081 = vsyncpa [#allocation26], 1 }
0x11f7   :  { %3082 = vsyncpa [#allocation29], 1 }
0x11f8   :  { %3083 = vsyncpa [#allocation6], 1 }
0x11f9   :  { %3085 = vsyncpa [#allocation6 + $0x1], 1 }

</bundles_post_ra>
